<compile_context>
chip_gen: v5e
topology: v5e:2x2
jax: 0.10.0
libtpu: 0.0.40
codegen_flags: <defaults>
</compile_context>

<pallas_src>
import jax
import jax.numpy as jnp
from jax.experimental import pallas as pl
from jax.experimental.pallas import tpu as pltpu

K_IN = 28 * 28          # 784
K_PAD = 896             # 7 * 128
HIDDEN = 512
N_OUT = 10
N_PAD = 128             # lane-dense output width


def _round_up(v, m):
    return (v + m - 1) // m * m


def mlp_kernel(x_ref, w1_ref, b1_ref, w2_ref, b2_ref, o_ref):
    # x_ref : (TM, 896)  bf16      w1_ref: (896, 512) bf16   b1_ref: (1, 512) f32
    # w2_ref: (512, 128) bf16      b2_ref: (1, 128)   f32    o_ref : (TM, 128) f32
    h = jnp.dot(x_ref[...], w1_ref[...],
                preferred_element_type=jnp.float32) + b1_ref[...]
    h = jnp.maximum(h, 0.0)                                   # ReLU (VPU, f32)
    out = jnp.dot(h.astype(jnp.bfloat16), w2_ref[...],
                  preferred_element_type=jnp.float32) + b2_ref[...]
    o_ref[...] = out.astype(o_ref.dtype)


def mnist_forward(x_nchw, w1, b1, w2, b2):
    """x_nchw: (B, 1, 28, 28) float32 -> logits (B, 10) float32."""
    B = x_nchw.shape[0]
    x = x_nchw.reshape(B, K_IN)                 # same as torch x.view(-1, 784)

    # Batch tile: 256 rows feeds the 256-wide MXU on v6e/v7x; small batches
    # just round up to the f32 sublane multiple (8) and run one grid step.
    TM = 256 if B >= 256 else _round_up(B, 8)
    B_pad = _round_up(B, TM)

    # Zero-pad (exact) and cast to bf16 for the MXU; biases stay f32.
    x_p = jnp.zeros((B_pad, K_PAD), jnp.bfloat16).at[:B, :K_IN].set(
        x.astype(jnp.bfloat16))
    w1_p = jnp.zeros((K_PAD, HIDDEN), jnp.bfloat16).at[:K_IN, :].set(
        w1.astype(jnp.bfloat16))
    w2_p = jnp.zeros((HIDDEN, N_PAD), jnp.bfloat16).at[:, :N_OUT].set(
        w2.astype(jnp.bfloat16))
    b1_2d = b1.reshape(1, HIDDEN).astype(jnp.float32)
    b2_2d = jnp.zeros((1, N_PAD), jnp.float32).at[0, :N_OUT].set(
        b2.astype(jnp.float32))

    grid = (B_pad // TM,)
    out_padded = pl.pallas_call(
        mlp_kernel,
        out_shape=jax.ShapeDtypeStruct((B_pad, N_PAD), jnp.float32),
        grid=grid,
        in_specs=[
            pl.BlockSpec((TM, K_PAD), lambda i: (i, 0)),      # x: tiled over batch
            pl.BlockSpec((K_PAD, HIDDEN), lambda i: (0, 0)),  # w1: VMEM-resident
            pl.BlockSpec((1, HIDDEN), lambda i: (0, 0)),      # b1
            pl.BlockSpec((HIDDEN, N_PAD), lambda i: (0, 0)),  # w2
            pl.BlockSpec((1, N_PAD), lambda i: (0, 0)),       # b2
        ],
        out_specs=pl.BlockSpec((TM, N_PAD), lambda i: (i, 0)),
        compiler_params=pltpu.CompilerParams(
            dimension_semantics=("parallel",),   # lets v7x use both TensorCores
            vmem_limit_bytes=32 << 20,           # headroom on v7x's 64 MiB VMEM
        ),
    )(x_p, w1_p, b1_2d, w2_p, b2_2d)

    return out_padded[:B, :N_OUT]


def init_params(key):
    """Deterministic init matching nn.Linear shapes (uniform like torch default)."""
    k1, k2, k3, k4 = jax.random.split(key, 4)
    lim1 = 1.0 / K_IN ** 0.5
    lim2 = 1.0 / HIDDEN ** 0.5
    # Stored as (in, out) so the kernel does x @ W (torch stores (out, in)).
    w1 = jax.random.uniform(k1, (K_IN, HIDDEN), jnp.float32, -lim1, lim1)
    b1 = jax.random.uniform(k2, (HIDDEN,), jnp.float32, -lim1, lim1)
    w2 = jax.random.uniform(k3, (HIDDEN, N_OUT), jnp.float32, -lim2, lim2)
    b2 = jax.random.uniform(k4, (N_OUT,), jnp.float32, -lim2, lim2)
    return w1, b1, w2, b2


if __name__ == "__main__":
    key = jax.random.PRNGKey(0)
    kx, kp = jax.random.split(key)

    batch = 2
    x = jax.random.normal(kx, (batch, 1, 28, 28), jnp.float32)   # NCHW like MNIST
    w1, b1, w2, b2 = init_params(kp)

    logits = mnist_forward(x, w1, b1, w2, b2)
    jax.block_until_ready(logits)

    # Pure-JAX f32 reference of the same math (kernel uses bf16 weights/x with
    # f32 accumulation, so compare with a looser tolerance).
    xf = x.reshape(batch, -1)
    ref = jnp.maximum(xf @ w1 + b1, 0.0) @ w2 + b2
    assert logits.shape == (batch, N_OUT)
    assert jnp.allclose(logits, ref, atol=5e-2, rtol=5e-2), float(
        jnp.max(jnp.abs(logits - ref)))

    print("KERNEL_OK")
</pallas_src>

<mosaic_0001>
module attributes {stable_mosaic.version = 11 : i64} {
  func.func @mlp_kernel(%arg0: i32, %arg1: memref<8x896xbf16, #tpu.memory_space<vmem>>, %arg2: memref<896x512xbf16, #tpu.memory_space<vmem>>, %arg3: memref<1x512xf32, #tpu.memory_space<vmem>>, %arg4: memref<512x128xbf16, #tpu.memory_space<vmem>>, %arg5: memref<1x128xf32, #tpu.memory_space<vmem>>, %arg6: memref<8x128xf32, #tpu.memory_space<vmem>>) attributes {dimension_semantics = [#tpu.dimension_semantics<parallel>], iteration_bounds = array<i64: 1>, scalar_prefetch = 0 : i64, scratch_operands = 0 : i64, tpu.core_type = #tpu.core_type<tc>, window_params = [{transform_indices = @transform_0, window_bounds = array<i64: 8, 896>}, {pipeline_mode = #tpu.pipeline_mode<synchronous>, transform_indices = @transform_1, window_bounds = array<i64: 896, 512>}, {pipeline_mode = #tpu.pipeline_mode<synchronous>, transform_indices = @transform_2, window_bounds = array<i64: 1, 512>}, {pipeline_mode = #tpu.pipeline_mode<synchronous>, transform_indices = @transform_3, window_bounds = array<i64: 512, 128>}, {pipeline_mode = #tpu.pipeline_mode<synchronous>, transform_indices = @transform_4, window_bounds = array<i64: 1, 128>}, {transform_indices = @transform_5, window_bounds = array<i64: 8, 128>}]} {
    %c0 = arith.constant 0 : index
    %c0_0 = arith.constant 0 : index
    %0 = vector.load %arg1[%c0, %c0_0] : memref<8x896xbf16, #tpu.memory_space<vmem>>, vector<8x896xbf16>
    %c0_1 = arith.constant 0 : index
    %c0_2 = arith.constant 0 : index
    %1 = vector.load %arg2[%c0_1, %c0_2] : memref<896x512xbf16, #tpu.memory_space<vmem>>, vector<896x512xbf16>
    %cst = arith.constant dense<0.000000e+00> : vector<8x512xf32>
    %2 = tpu.matmul %0, %1, %cst {dimension_numbers = #tpu.dot_dimension_numbers<[1], [0], [0], [1], [0, 0, 1, 1], [], []>} : vector<8x896xbf16>, vector<896x512xbf16>, vector<8x512xf32> -> vector<8x512xf32>
    %c0_3 = arith.constant 0 : index
    %c0_4 = arith.constant 0 : index
    %3 = vector.load %arg3[%c0_3, %c0_4] : memref<1x512xf32, #tpu.memory_space<vmem>>, vector<1x512xf32>
    %4 = vector.broadcast %3 : vector<1x512xf32> to vector<8x512xf32>
    %5 = arith.addf %2, %4 : vector<8x512xf32>
    %cst_5 = arith.constant 0.000000e+00 : f32
    %6 = vector.broadcast %cst_5 : f32 to vector<8x512xf32>
    %7 = arith.maximumf %5, %6 : vector<8x512xf32>
    %8 = arith.truncf %7 : vector<8x512xf32> to vector<8x512xbf16>
    %c0_6 = arith.constant 0 : index
    %c0_7 = arith.constant 0 : index
    %9 = vector.load %arg4[%c0_6, %c0_7] : memref<512x128xbf16, #tpu.memory_space<vmem>>, vector<512x128xbf16>
    %cst_8 = arith.constant dense<0.000000e+00> : vector<8x128xf32>
    %10 = tpu.matmul %8, %9, %cst_8 {dimension_numbers = #tpu.dot_dimension_numbers<[1], [0], [0], [1], [0, 0, 1, 1], [], []>} : vector<8x512xbf16>, vector<512x128xbf16>, vector<8x128xf32> -> vector<8x128xf32>
    %c0_9 = arith.constant 0 : index
    %c0_10 = arith.constant 0 : index
    %11 = vector.load %arg5[%c0_9, %c0_10] : memref<1x128xf32, #tpu.memory_space<vmem>>, vector<1x128xf32>
    %12 = vector.broadcast %11 : vector<1x128xf32> to vector<8x128xf32>
    %13 = arith.addf %10, %12 : vector<8x128xf32>
    %c0_11 = arith.constant 0 : index
    %c0_12 = arith.constant 0 : index
    %14 = vector.load %arg6[%c0_11, %c0_12] : memref<8x128xf32, #tpu.memory_space<vmem>>, vector<8x128xf32>
    tpu.vector_store %arg6[%c0_11, %c0_12], %13 {strides = array<i32>} : memref<8x128xf32, #tpu.memory_space<vmem>>, vector<8x128xf32>,
    return
  }
  func.func @transform_0(%arg0: i32) -> (i32, i32) {
    %c0_i32 = arith.constant 0 : i32
    %c0_i32_0 = arith.constant 0 : i32
    return %arg0, %c0_i32 : i32, i32
  }
  func.func @transform_1(%arg0: i32) -> (i32, i32) {
    %c0_i32 = arith.constant 0 : i32
    %c0_i32_0 = arith.constant 0 : i32
    %c0_i32_1 = arith.constant 0 : i32
    return %c0_i32, %c0_i32_0 : i32, i32
  }
  func.func @transform_2(%arg0: i32) -> (i32, i32) {
    %c0_i32 = arith.constant 0 : i32
    %c0_i32_0 = arith.constant 0 : i32
    %c0_i32_1 = arith.constant 0 : i32
    return %c0_i32, %c0_i32_0 : i32, i32
  }
  func.func @transform_3(%arg0: i32) -> (i32, i32) {
    %c0_i32 = arith.constant 0 : i32
    %c0_i32_0 = arith.constant 0 : i32
    %c0_i32_1 = arith.constant 0 : i32
    return %c0_i32, %c0_i32_0 : i32, i32
  }
  func.func @transform_4(%arg0: i32) -> (i32, i32) {
    %c0_i32 = arith.constant 0 : i32
    %c0_i32_0 = arith.constant 0 : i32
    %c0_i32_1 = arith.constant 0 : i32
    return %c0_i32, %c0_i32_0 : i32, i32
  }
  func.func @transform_5(%arg0: i32) -> (i32, i32) {
    %c0_i32 = arith.constant 0 : i32
    %c0_i32_0 = arith.constant 0 : i32
    return %arg0, %c0_i32 : i32, i32
  }
}

</mosaic_0001>

<bundles_post_ra>
// kernel: tpu_custom_call.1
= control target key start
LH: loop header
LB: loop body
LE: loop exit
PB: predicated region body
PF: predicated region fallthrough
CT: control target
= control target key end

     0   :  { %10 = vsyncpa [#allocation3], 0  ;;  %s3714_s0 = inlined_call_operand.hbm [shape: bf16[8,896], index: 0, kind: input, shape index: {}]   ;;  %s3715_s1 = inlined_call_operand.hbm [shape: bf16[896,512], index: 1, kind: input, shape index: {}]   ;;  %s3716_s2 = inlined_call_operand.hbm [shape: f32[1,512], index: 2, kind: input, shape index: {}]   ;;  %s3717_s3 = inlined_call_operand.hbm [shape: bf16[512,128], index: 3, kind: input, shape index: {}]   ;;  %s3718_s4 = inlined_call_operand.vmem [shape: f32[1,128], index: 4, kind: input, shape index: {}]   ;;  %s3719_s5 = inlined_call_operand.hbm [shape: f32[8,128], index: 5, kind: output, shape index: {}]  }
   0x1   :  { %11 = vsyncpa [#allocation6], 0 }
   0x2   :  { %12 = vsyncpa [#allocation9], 0  ;;  %s29_s20 = sshll.u32 %s3715_s1, 4  ;;  %s30_s20 = int_to_ptr.hbm [resolvable:$true] %s29_s20 }
   0x3   :  { %13 = vsyncpa [#allocation4], 0  ;;  %s3585_s21 = smov [#allocation5]   ;;  %s19_s25 = sshll.u32 %s3714_s0, 4  ;;  %s20_s25 = int_to_ptr.hbm [resolvable:$true] %s19_s25 }
   0x4   :  { %s31_s22 = sshll.u32 %s3585_s21, 4  ;;  %s3586_s26 = smov 256   ;;  %s32_s22 = int_to_ptr.vmem [resolvable:$true] %s31_s22 }
   0x5   :  { %s3587_s27 = smov 16   ;;  %s3588_s28 = smov [#allocation2]  }
   0x6   :  { %37 = dma.hbm_to_vmem [thread:$0]  %s30_s20, 28672, %s32_s22, [#allocation6], %s3586_s26, %s3586_s26, %s3587_s27  }
   0x7   :  { %s21_s29 = sshll.u32 %s3588_s28, 4  ;;  %s43_s7 = sshll.u32 %s3716_s2, 4  ;;  %s22_s29 = int_to_ptr.vmem [resolvable:$true] %s21_s29  ;;  %s44_s7 = int_to_ptr.hbm [resolvable:$true] %s43_s7 }
   0x8   :  { %24 = dma.hbm_to_vmem [thread:$0]  %s20_s25, 448, %s22_s29, [#allocation3]  }
   0x9   :  { %s53_s9 = sshll.u32 %s3717_s3, 4  ;;  %s3589_s10 = smov [#allocation7]   ;;  %s54_s9 = int_to_ptr.hbm [resolvable:$true] %s53_s9 }
   0xa   :  { %s45_s11 = sshll.u32 %s3589_s10, 4  ;;  %s3590_s0 = smov [#allocation8]   ;;  %s46_s11 = int_to_ptr.vmem [resolvable:$true] %s45_s11 }
   0xb   :  { %48 = dma.hbm_to_vmem [thread:$0]  %s44_s7, 64, %s46_s11, [#allocation6]  }
   0xc   :  { %s55_s12 = sshll.u32 %s3590_s0, 4  ;;  %s3591_s13 = smov 64   ;;  %s56_s12 = int_to_ptr.vmem [resolvable:$true] %s55_s12 }
   0xd   :  { %s3592_s14 = smov 4  }
   0xe   :  { %61 = dma.hbm_to_vmem [thread:$0]  %s54_s9, 4096, %s56_s12, [#allocation9], %s3591_s13, %s3591_s13, %s3592_s14  }
   0xf   :  { %3577 = dma.done.wait [#allocation3], 448  }
  0x10   :  { %3578 = vsyncadd [#allocation3], 4294966848 }
  0x11   :  { %3579 = dma.done.wait [#allocation6], 28736  }
  0x12   :  { %3580 = vsyncadd [#allocation6], 4294938560 }
  0x13   :  { %3581 = dma.done.wait [#allocation9], 4096  }
  0x14   :  { %3582 = vsyncadd [#allocation9], 4294963200  ;;  %v2281_v0 = vld [vmem:[#allocation5 + $0xe0] sm:$0xf]  ;;  %v3221_v1 = vld [vmem:[#allocation5 + $0xec] sm:$0xf0] }
  0x15   :  { %v2409_v2 = vld [vmem:[#allocation5 + $0x1e0] sm:$0xf]  ;;  %v2282_v3 = vor.u32 %v3221_v1, %v2281_v0  ;;  %v3253_v4 = vld [vmem:[#allocation5 + $0x1ec] sm:$0xf0]  ;;  %s3593_s15 = smov [#allocation10]   ;;  %s2155_s19 = sshll.u32 %s3719_s5, 4  ;;  %s2156_s19 = int_to_ptr.hbm [resolvable:$true] %s2155_s19 }
  0x16   :  { %v2537_v5 = vld [vmem:[#allocation5 + $0x2e0] sm:$0xf]  ;;  %v3285_v6 = vld [vmem:[#allocation5 + $0x2ec] sm:$0xf0]  ;;  %v2410_v7 = vor.u32 %v3253_v4, %v2409_v2  ;;  %s2153_s16 = sshll.u32 %s3593_s15, 4  ;;  %s2154_s16 = int_to_ptr.vmem [resolvable:$true] %s2153_s16 }
  0x17   :  { %v2538_v8 = vor.u32 %v3285_v6, %v2537_v5  ;;  %v2665_v9 = vld [vmem:[#allocation5 + $0x3e0] sm:$0xf]  ;;  %v3317_v10 = vld [vmem:[#allocation5 + $0x3ec] sm:$0xf0]  ;;  %1463 = vmatpush.bf16.msra.mxu0 %v2282_v3 }
  0x18   :  { %v2265_v11 = vld [vmem:[#allocation5 + $0xc0] sm:$0xf]  ;;  %v2666_v12 = vor.u32 %v3317_v10, %v2665_v9  ;;  %v3217_v13 = vld [vmem:[#allocation5 + $0xcc] sm:$0xf0]  ;;  %1476 = vmatpush.bf16.msra.mxu1 %v2410_v7 }
  0x19   :  { %v2393_v14 = vld [vmem:[#allocation5 + $0x1c0] sm:$0xf]  ;;  %v3249_v15 = vld [vmem:[#allocation5 + $0x1cc] sm:$0xf0]  ;;  %1489 = vmatpush.bf16.msra.mxu2 %v2538_v8  ;;  %v2266_v16 = vor.u32 %v3217_v13, %v2265_v11 }
  0x1a   :  { %v2394_v17 = vor.u32 %v3249_v15, %v2393_v14  ;;  %v2521_v18 = vld [vmem:[#allocation5 + $0x2c0] sm:$0xf]  ;;  %v3281_v19 = vld [vmem:[#allocation5 + $0x2cc] sm:$0xf0]  ;;  %1502 = vmatpush.bf16.msra.mxu3 %v2666_v12 }
  0x1b   :  { %v2649_v20 = vld [vmem:[#allocation5 + $0x3c0] sm:$0xf]  ;;  %v2522_v21 = vor.u32 %v3281_v19, %v2521_v18  ;;  %v3313_v22 = vld [vmem:[#allocation5 + $0x3cc] sm:$0xf0]  ;;  %1464 = vmatpush.bf16.msra.mxu0 %v2266_v16 }
  0x1c   :  { %v2249_v23 = vld [vmem:[#allocation5 + $0xa0] sm:$0xf]  ;;  %v3213_v24 = vld [vmem:[#allocation5 + $0xac] sm:$0xf0]  ;;  %v2650_v25 = vor.u32 %v3313_v22, %v2649_v20  ;;  %1477 = vmatpush.bf16.msra.mxu1 %v2394_v17 }
  0x1d   :  { %v2377_v26 = vld [vmem:[#allocation5 + $0x1a0] sm:$0xf]  ;;  %v3245_v27 = vld [vmem:[#allocation5 + $0x1ac] sm:$0xf0]  ;;  %v2250_v29 = vor.u32 %v3213_v24, %v2249_v23  ;;  %1490 = vmatpush.bf16.msra.mxu2 %v2522_v21 }
  0x1e   :  { %v2505_v28 = vld [vmem:[#allocation5 + $0x2a0] sm:$0xf]  ;;  %v3277_v30 = vld [vmem:[#allocation5 + $0x2ac] sm:$0xf0]  ;;  %v2378_v33 = vor.u32 %v3245_v27, %v2377_v26  ;;  %1503 = vmatpush.bf16.msra.mxu3 %v2650_v25 }
  0x1f   :  { %v2633_v31 = vld [vmem:[#allocation5 + $0x3a0] sm:$0xf]  ;;  %v3309_v32 = vld [vmem:[#allocation5 + $0x3ac] sm:$0xf0]  ;;  %v2506_v34 = vor.u32 %v3277_v30, %v2505_v28  ;;  %1465 = vmatpush.bf16.msra.mxu0 %v2250_v29 }
  0x20   :  { %v2233_v35 = vld [vmem:[#allocation5 + $0x80] sm:$0xf]  ;;  %v3209_v36 = vld [vmem:[#allocation5 + $0x8c] sm:$0xf0]  ;;  %v2634_v38 = vor.u32 %v3309_v32, %v2633_v31  ;;  %1478 = vmatpush.bf16.msra.mxu1 %v2378_v33 }
  0x21   :  { %v2361_v37 = vld [vmem:[#allocation5 + $0x180] sm:$0xf]  ;;  %v3241_v39 = vld [vmem:[#allocation5 + $0x18c] sm:$0xf0]  ;;  %v2234_v44 = vor.u32 %v3209_v36, %v2233_v35  ;;  %1491 = vmatpush.bf16.msra.mxu2 %v2506_v34 }
  0x22   :  { %v2489_v40 = vld [vmem:[#allocation5 + $0x280] sm:$0xf]  ;;  %v3273_v41 = vld [vmem:[#allocation5 + $0x28c] sm:$0xf0]  ;;  %v2362_v45 = vor.u32 %v3241_v39, %v2361_v37  ;;  %1504 = vmatpush.bf16.msra.mxu3 %v2634_v38  ;;  %v3219_v37 = vld [vmem:[#allocation5 + $0xe4] sm:$0xf] }
  0x23   :  { %v2617_v42 = vld [vmem:[#allocation5 + $0x380] sm:$0xf]  ;;  %v3305_v43 = vld [vmem:[#allocation5 + $0x38c] sm:$0xf0]  ;;  %v2490_v46 = vor.u32 %v3273_v41, %v2489_v40  ;;  %1466 = vmatpush.bf16.msra.mxu0 %v2234_v44  ;;  %v2283_v38 = vld [vmem:[#allocation5 + $0xf0] sm:$0xf0] }
  0x24   :  { %v2217_v47 = vld [vmem:[#allocation5 + $0x60] sm:$0xf]  ;;  %v3205_v48 = vld [vmem:[#allocation5 + $0x6c] sm:$0xf0]  ;;  %v2618_v50 = vor.u32 %v3305_v43, %v2617_v42  ;;  %1479 = vmatpush.bf16.msra.mxu1 %v2362_v45 }
  0x25   :  { %v2345_v49 = vld [vmem:[#allocation5 + $0x160] sm:$0xf]  ;;  %v3237_v51 = vld [vmem:[#allocation5 + $0x16c] sm:$0xf0]  ;;  %v2218_v56 = vor.u32 %v3205_v48, %v2217_v47  ;;  %1492 = vmatpush.bf16.msra.mxu2 %v2490_v46  ;;  %v2286_v46 = vor.u32 %v3219_v37, %v2283_v38 }
  0x26   :  { %v2473_v52 = vld [vmem:[#allocation5 + $0x260] sm:$0xf]  ;;  %v3269_v53 = vld [vmem:[#allocation5 + $0x26c] sm:$0xf0]  ;;  %v2346_v57 = vor.u32 %v3237_v51, %v2345_v49  ;;  %1505 = vmatpush.bf16.msra.mxu3 %v2618_v50  ;;  %v3215_v50 = vld [vmem:[#allocation5 + $0xc4] sm:$0xf] }
  0x27   :  { %v2601_v54 = vld [vmem:[#allocation5 + $0x360] sm:$0xf]  ;;  %v3301_v55 = vld [vmem:[#allocation5 + $0x36c] sm:$0xf0]  ;;  %v2474_v58 = vor.u32 %v3269_v53, %v2473_v52  ;;  %1467 = vmatpush.bf16.msra.mxu0 %v2218_v56  ;;  %v2267_v51 = vld [vmem:[#allocation5 + $0xd0] sm:$0xf0] }
  0x28   :  { %v2201_v59 = vld [vmem:[#allocation5 + $0x40] sm:$0xf]  ;;  %v3201_v60 = vld [vmem:[#allocation5 + $0x4c] sm:$0xf0]  ;;  %v2602_v62 = vor.u32 %v3301_v55, %v2601_v54  ;;  %1480 = vmatpush.bf16.msra.mxu1 %v2346_v57 }
  0x29   :  { %v2329_v61 = vld [vmem:[#allocation5 + $0x140] sm:$0xf]  ;;  %v3233_v63 = vld [vmem:[#allocation5 + $0x14c] sm:$0xf0]  ;;  %v2202_v4 = vor.u32 %v3201_v60, %v2201_v59  ;;  %1493 = vmatpush.bf16.msra.mxu2 %v2474_v58  ;;  %v2270_v59 = vor.u32 %v3215_v50, %v2267_v51 }
  0x2a   :  { %v2457_v0 = vld [vmem:[#allocation5 + $0x240] sm:$0xf]  ;;  %v3265_v1 = vld [vmem:[#allocation5 + $0x24c] sm:$0xf0]  ;;  %v2330_v5 = vor.u32 %v3233_v63, %v2329_v61  ;;  %1506 = vmatpush.bf16.msra.mxu3 %v2602_v62  ;;  %v3211_v62 = vld [vmem:[#allocation5 + $0xa4] sm:$0xf] }
  0x2b   :  { %v2585_v2 = vld [vmem:[#allocation5 + $0x340] sm:$0xf]  ;;  %v3297_v3 = vld [vmem:[#allocation5 + $0x34c] sm:$0xf0]  ;;  %v2458_v6 = vor.u32 %v3265_v1, %v2457_v0  ;;  %1468 = vmatpush.bf16.msra.mxu0 %v2202_v4  ;;  %v2251_v63 = vld [vmem:[#allocation5 + $0xb0] sm:$0xf0] }
  0x2c   :  { %v2185_v7 = vld [vmem:[#allocation5 + $0x20] sm:$0xf]  ;;  %v3197_v8 = vld [vmem:[#allocation5 + $0x2c] sm:$0xf0]  ;;  %v2586_v10 = vor.u32 %v3297_v3, %v2585_v2  ;;  %1481 = vmatpush.bf16.msra.mxu1 %v2330_v5  ;;  %v80_v3 = vld [vmem:[#allocation2] sm:$0xff] }
  0x2d   :  { %v2313_v9 = vld [vmem:[#allocation5 + $0x120] sm:$0xf]  ;;  %v3229_v11 = vld [vmem:[#allocation5 + $0x12c] sm:$0xf0]  ;;  %v2186_v16 = vor.u32 %v3197_v8, %v2185_v7  ;;  %1494 = vmatpush.bf16.msra.mxu2 %v2458_v6 }
  0x2e   :  { %v2441_v12 = vld [vmem:[#allocation5 + $0x220] sm:$0xf]  ;;  %v3261_v13 = vld [vmem:[#allocation5 + $0x22c] sm:$0xf0]  ;;  %v2314_v19 = vor.u32 %v3229_v11, %v2313_v9  ;;  %1507 = vmatpush.bf16.msra.mxu3 %v2586_v10  ;;  %v322_v9 = vunpack.c.l.b16 %v80_v3  ;;  %v2254_v11 = vor.u32 %v3211_v62, %v2251_v63 }
  0x2f   :  { %v2569_v14 = vld [vmem:[#allocation5 + $0x320] sm:$0xf]  ;;  %v3293_v15 = vld [vmem:[#allocation5 + $0x32c] sm:$0xf0]  ;;  %v2442_v20 = vor.u32 %v3261_v13, %v2441_v12  ;;  %1469 = vmatpush.bf16.msra.mxu0 %v2186_v16  ;;  %v3207_v16 = vld [vmem:[#allocation5 + $0x84] sm:$0xf] }
  0x30   :  { %v2169_v17 = vld [vmem:[#allocation5] sm:$0xf]  ;;  %v3193_v18 = vld [vmem:[#allocation5 + $0xc] sm:$0xf0]  ;;  %v2570_v24 = vor.u32 %v3293_v15, %v2569_v14  ;;  %1482 = vmatpush.bf16.msra.mxu1 %v2314_v19  ;;  %v323_v15 = vunpack.c.h.b16 %v80_v3  ;;  %v3638_v19 = vpack.c.b16 %v322_v9, %v322_v9  ;;  %v83_v3 = vld [vmem:[#allocation2 + $0x18] sm:$0xf] }
  0x31   :  { %v2297_v21 = vld [vmem:[#allocation5 + $0x100] sm:$0xf]  ;;  %v3225_v22 = vld [vmem:[#allocation5 + $0x10c] sm:$0xf0]  ;;  %v2170_v31 = vor.u32 %v3193_v18, %v2169_v17  ;;  %1495 = vmatpush.bf16.msra.mxu2 %v2442_v20  ;;  %v2235_v17 = vld [vmem:[#allocation5 + $0x90] sm:$0xf0] }
  0x32   :  { %v2425_v23 = vld [vmem:[#allocation5 + $0x200] sm:$0xf]  ;;  %v3257_v25 = vld [vmem:[#allocation5 + $0x20c] sm:$0xf0]  ;;  %v2298_v35 = vor.u32 %v3225_v22, %v2297_v21  ;;  %1508 = vmatpush.bf16.msra.mxu3 %v2570_v24  ;;  %v3642_v22 = vpack.c.b16 %v323_v15, %v323_v15  ;;  %v2411_v9 = vld [vmem:[#allocation5 + $0x1f0] sm:$0xf0]  ;;  %v328_v15 = vunpack.c.l.b16 %v83_v3 }
  0x33   :  { %v2553_v26 = vld [vmem:[#allocation5 + $0x300] sm:$0xf]  ;;  %v3289_v27 = vld [vmem:[#allocation5 + $0x30c] sm:$0xf0]  ;;  %v2426_v36 = vor.u32 %v3257_v25, %v2425_v23  ;;  %1470 = vmatpush.bf16.msra.mxu0 %v2170_v31 }
  0x34   :  { %v2793_v28 = vld [vmem:[#allocation5 + $0x4e0] sm:$0xf]  ;;  %v3349_v29 = vld [vmem:[#allocation5 + $0x4ec] sm:$0xf0]  ;;  %v2554_v39 = vor.u32 %v3289_v27, %v2553_v26  ;;  %1483 = vmatpush.bf16.msra.mxu1 %v2298_v35 }
  0x35   :  { %v2921_v30 = vld [vmem:[#allocation5 + $0x5e0] sm:$0xf]  ;;  %v3381_v32 = vld [vmem:[#allocation5 + $0x5ec] sm:$0xf0]  ;;  %v2794_v40 = vor.u32 %v3349_v29, %v2793_v28  ;;  %1496 = vmatpush.bf16.msra.mxu2 %v2426_v36  ;;  %v2238_v28 = vor.u32 %v3207_v16, %v2235_v17 }
  0x36   :  { %v3049_v33 = vld [vmem:[#allocation5 + $0x6e0] sm:$0xf]  ;;  %v3413_v34 = vld [vmem:[#allocation5 + $0x6ec] sm:$0xf0]  ;;  %v2922_v41 = vor.u32 %v3381_v32, %v2921_v30  ;;  %1509 = vmatpush.bf16.msra.mxu3 %v2554_v39  ;;  %v3203_v32 = vld [vmem:[#allocation5 + $0x64] sm:$0xf]  ;;  %1471 = vmatmul.bf16.vlgmr.msra.gmra.mxu0 %v3638_v19 }
  0x37   :  { %v3050_v42 = vor.u32 %v3413_v34, %v3049_v33  ;;  %v2777_v43 = vld [vmem:[#allocation5 + $0x4c0] sm:$0xf]  ;;  %v3345_v44 = vld [vmem:[#allocation5 + $0x4cc] sm:$0xf0]  ;;  %1515 = vmatpush.bf16.msrb.mxu0 %v2794_v40  ;;  %v2219_v33 = vld [vmem:[#allocation5 + $0x70] sm:$0xf0]  ;;  %1484 = vmatmul.bf16.vlgmr.msra.gmra.mxu1 %v3642_v22 }
  0x38   :  { %v2905_v45 = vld [vmem:[#allocation5 + $0x5c0] sm:$0xf]  ;;  %v3377_v47 = vld [vmem:[#allocation5 + $0x5cc] sm:$0xf0]  ;;  %v2778_v52 = vor.u32 %v3345_v44, %v2777_v43  ;;  %1528 = vmatpush.bf16.msrb.mxu1 %v2922_v41  ;;  %v2222_v40 = vor.u32 %v3203_v32, %v2219_v33  ;;  %v3199_v44 = vld [vmem:[#allocation5 + $0x44] sm:$0xf] }
  0x39   :  { %v3033_v48 = vld [vmem:[#allocation5 + $0x6c0] sm:$0xf]  ;;  %v3409_v49 = vld [vmem:[#allocation5 + $0x6cc] sm:$0xf0]  ;;  %1541 = vmatpush.bf16.msrb.mxu2 %v3050_v42  ;;  %v2906_v54 = vor.u32 %v3377_v47, %v2905_v45  ;;  %v2203_v45 = vld [vmem:[#allocation5 + $0x50] sm:$0xf0] }
  0x3a   :  { %v2761_v53 = vld [vmem:[#allocation5 + $0x4a0] sm:$0xf]  ;;  %v3034_v55 = vor.u32 %v3409_v49, %v3033_v48  ;;  %v3341_v56 = vld [vmem:[#allocation5 + $0x4ac] sm:$0xf0]  ;;  %1554 = vmatpush.bf16.msrb.mxu3 %v2286_v46  ;;  %v3279_v32 = vld [vmem:[#allocation5 + $0x2c4] sm:$0xf] }
  0x3b   :  { %v2889_v57 = vld [vmem:[#allocation5 + $0x5a0] sm:$0xf]  ;;  %v3373_v58 = vld [vmem:[#allocation5 + $0x5ac] sm:$0xf0]  ;;  %1516 = vmatpush.bf16.msrb.mxu0 %v2778_v52  ;;  %v2762_v0 = vor.u32 %v3341_v56, %v2761_v53  ;;  %v2206_v52 = vor.u32 %v3199_v44, %v2203_v45  ;;  %v3195_v56 = vld [vmem:[#allocation5 + $0x24] sm:$0xf] }
  0x3c   :  { %v3017_v60 = vld [vmem:[#allocation5 + $0x6a0] sm:$0xf]  ;;  %v3405_v61 = vld [vmem:[#allocation5 + $0x6ac] sm:$0xf0]  ;;  %v2890_v1 = vor.u32 %v3373_v58, %v2889_v57  ;;  %1529 = vmatpush.bf16.msrb.mxu1 %v2906_v54  ;;  %v2187_v57 = vld [vmem:[#allocation5 + $0x30] sm:$0xf0] }
  0x3d   :  { %v81_v2 = vld [vmem:[#allocation2 + $0x8] sm:$0xff]  ;;  %1542 = vmatpush.bf16.msrb.mxu2 %v3034_v55  ;;  %v3018_v4 = vor.u32 %v3405_v61, %v3017_v60  ;;  %v2745_v5 = vld [vmem:[#allocation5 + $0x480] sm:$0xf]  ;;  %v3243_v45 = vld [vmem:[#allocation5 + $0x1a4] sm:$0xf] }
  0x3e   :  { %v3337_v6 = vld [vmem:[#allocation5 + $0x48c] sm:$0xf0]  ;;  %v2873_v7 = vld [vmem:[#allocation5 + $0x580] sm:$0xf]  ;;  %v324_v8 = vunpack.c.l.b16 %v81_v2  ;;  %v325_v10 = vunpack.c.h.b16 %v81_v2  ;;  %1555 = vmatpush.bf16.msrb.mxu3 %v2270_v59 }
  0x3f   :  { %v3369_v12 = vld [vmem:[#allocation5 + $0x58c] sm:$0xf0]  ;;  %v3001_v13 = vld [vmem:[#allocation5 + $0x680] sm:$0xf]  ;;  %1517 = vmatpush.bf16.msrb.mxu0 %v2762_v0  ;;  %v2746_v21 = vor.u32 %v3337_v6, %v2745_v5  ;;  %v3191_v5 = vld [vmem:[#allocation5 + $0x4] sm:$0xf] }
  0x40   :  { %v3401_v14 = vld [vmem:[#allocation5 + $0x68c] sm:$0xf0]  ;;  %v3636_v18 = vpack.c.b16 %v324_v8, %v324_v8  ;;  %v3640_v20 = vpack.c.b16 %v325_v10, %v325_v10  ;;  %1530 = vmatpush.bf16.msrb.mxu1 %v2890_v1  ;;  %v2874_v23 = vor.u32 %v3369_v12, %v2873_v7  ;;  %v2729_v25 = vld [vmem:[#allocation5 + $0x460] sm:$0xf]  ;;  %v2171_v6 = vld [vmem:[#allocation5 + $0x10] sm:$0xf0] }
  0x41   :  { %1543 = vmatpush.bf16.msrb.mxu2 %v3018_v4  ;;  %v3002_v24 = vor.u32 %v3401_v14, %v3001_v13  ;;  %v3333_v26 = vld [vmem:[#allocation5 + $0x46c] sm:$0xf0]  ;;  %v2857_v27 = vld [vmem:[#allocation5 + $0x560] sm:$0xf]  ;;  %v2190_v4 = vor.u32 %v3195_v56, %v2187_v57  ;;  %v82_v7 = vld [vmem:[#allocation2 + $0x10] sm:$0xff] }
  0x42   :  { %1556 = vmatpush.bf16.msrb.mxu3 %v2254_v11  ;;  %v3365_v29 = vld [vmem:[#allocation5 + $0x56c] sm:$0xf0]  ;;  %v2985_v30 = vld [vmem:[#allocation5 + $0x660] sm:$0xf]  ;;  %1497 = vmatmul.bf16.vlgmr.msra.gmra.mxu2 %v3636_v18  ;;  %v2730_v34 = vor.u32 %v3333_v26, %v2729_v25  ;;  %v3251_v8 = vld [vmem:[#allocation5 + $0x1e4] sm:$0xf]  ;;  %v327_v25 = vunpack.c.h.b16 %v82_v7  ;;  %v2174_v26 = vor.u32 %v3191_v5, %v2171_v6 }
  0x43   :  { %v3397_v31 = vld [vmem:[#allocation5 + $0x66c] sm:$0xf0]  ;;  %1510 = vmatmul.bf16.vlgmr.msra.gmra.mxu3 %v3640_v20  ;;  %1518 = vmatpush.bf16.msrb.mxu0 %v2746_v21  ;;  %v2858_v35 = vor.u32 %v3365_v29, %v2857_v27  ;;  %v2713_v37 = vld [vmem:[#allocation5 + $0x440] sm:$0xf]  ;;  %v3283_v10 = vld [vmem:[#allocation5 + $0x2e4] sm:$0xf]  ;;  %v2414_v27 = vor.u32 %v3251_v8, %v2411_v9 }
  0x44   :  { %1531 = vmatpush.bf16.msrb.mxu1 %v2874_v23  ;;  %v2986_v36 = vor.u32 %v3397_v31, %v2985_v30  ;;  %v3329_v38 = vld [vmem:[#allocation5 + $0x44c] sm:$0xf0]  ;;  %v2841_v39 = vld [vmem:[#allocation5 + $0x540] sm:$0xf]  ;;  %v2539_v12 = vld [vmem:[#allocation5 + $0x2f0] sm:$0xf0] }
  0x45   :  { %1544 = vmatpush.bf16.msrb.mxu2 %v3002_v24  ;;  %v3361_v41 = vld [vmem:[#allocation5 + $0x54c] sm:$0xf0]  ;;  %v2969_v42 = vld [vmem:[#allocation5 + $0x640] sm:$0xf]  ;;  %v2714_v46 = vor.u32 %v3329_v38, %v2713_v37  ;;  %v3315_v13 = vld [vmem:[#allocation5 + $0x3e4] sm:$0xf]  ;;  %v326_v24 = vunpack.c.l.b16 %v82_v7  ;;  %v3648_v37 = vpack.c.b16 %v328_v15, %v328_v15 }
  0x46   :  { %1557 = vmatpush.bf16.msrb.mxu3 %v2238_v28  ;;  %v3393_v43 = vld [vmem:[#allocation5 + $0x64c] sm:$0xf0]  ;;  %v2842_v47 = vor.u32 %v3361_v41, %v2841_v39  ;;  %v2697_v49 = vld [vmem:[#allocation5 + $0x420] sm:$0xf]  ;;  %v2667_v14 = vld [vmem:[#allocation5 + $0x3f0] sm:$0xf0]  ;;  %v2542_v28 = vor.u32 %v3283_v10, %v2539_v12  ;;  %v3652_v41 = vpack.c.b16 %v327_v25, %v327_v25 }
  0x47   :  { %1519 = vmatpush.bf16.msrb.mxu0 %v2730_v34  ;;  %v2970_v48 = vor.u32 %v3393_v43, %v2969_v42  ;;  %v3325_v50 = vld [vmem:[#allocation5 + $0x42c] sm:$0xf0]  ;;  %v2825_v51 = vld [vmem:[#allocation5 + $0x520] sm:$0xf]  ;;  %v3347_v21 = vld [vmem:[#allocation5 + $0x4e4] sm:$0xf]  ;;  %v2670_v29 = vor.u32 %v3315_v13, %v2667_v14 }
  0x48   :  { %1532 = vmatpush.bf16.msrb.mxu1 %v2858_v35  ;;  %v3357_v53 = vld [vmem:[#allocation5 + $0x52c] sm:$0xf0]  ;;  %v2953_v54 = vld [vmem:[#allocation5 + $0x620] sm:$0xf]  ;;  %v2698_v59 = vor.u32 %v3325_v50, %v2697_v49  ;;  %v2795_v23 = vld [vmem:[#allocation5 + $0x4f0] sm:$0xf0] }
  0x49   :  { %1545 = vmatpush.bf16.msrb.mxu2 %v2986_v36  ;;  %v3389_v55 = vld [vmem:[#allocation5 + $0x62c] sm:$0xf0]  ;;  %v2681_v58 = vld [vmem:[#allocation5 + $0x400] sm:$0xf]  ;;  %v2826_v63 = vor.u32 %v3357_v53, %v2825_v51  ;;  %v3247_v30 = vld [vmem:[#allocation5 + $0x1c4] sm:$0xf]  ;;  %v2798_v33 = vor.u32 %v3347_v21, %v2795_v23 }
  0x4a   :  { %1558 = vmatpush.bf16.msrb.mxu3 %v2222_v40  ;;  %v3321_v60 = vld [vmem:[#allocation5 + $0x40c] sm:$0xf0]  ;;  %v2809_v61 = vld [vmem:[#allocation5 + $0x500] sm:$0xf]  ;;  %v2954_v0 = vor.u32 %v3389_v55, %v2953_v54  ;;  %v2395_v31 = vld [vmem:[#allocation5 + $0x1d0] sm:$0xf0]  ;;  %v3650_v40 = vpack.c.b16 %v326_v24, %v326_v24 }
  0x4b   :  { %1520 = vmatpush.bf16.msrb.mxu0 %v2714_v46  ;;  %v3353_v62 = vld [vmem:[#allocation5 + $0x50c] sm:$0xf0]  ;;  %v2937_v1 = vld [vmem:[#allocation5 + $0x600] sm:$0xf]  ;;  %v2682_v11 = vor.u32 %v3321_v60, %v2681_v58  ;;  %v2523_v34 = vld [vmem:[#allocation5 + $0x2d0] sm:$0xf0]  ;;  %v2398_v42 = vor.u32 %v3247_v30, %v2395_v31 }
  0x4c   :  { %1533 = vmatpush.bf16.msrb.mxu1 %v2842_v47  ;;  %v3385_v2 = vld [vmem:[#allocation5 + $0x60c] sm:$0xf0]  ;;  %v2810_v16 = vor.u32 %v3353_v62, %v2809_v61  ;;  %v3311_v35 = vld [vmem:[#allocation5 + $0x3c4] sm:$0xf]  ;;  %v2651_v36 = vld [vmem:[#allocation5 + $0x3d0] sm:$0xf0]  ;;  %v2526_v43 = vor.u32 %v3279_v32, %v2523_v34 }
  0x4d   :  { %1546 = vmatpush.bf16.msrb.mxu2 %v2970_v48  ;;  %v2938_v17 = vor.u32 %v3385_v2, %v2937_v1  ;;  %v3343_v38 = vld [vmem:[#allocation5 + $0x4c4] sm:$0xf]  ;;  %v2779_v39 = vld [vmem:[#allocation5 + $0x4d0] sm:$0xf0]  ;;  %v2654_v44 = vor.u32 %v3311_v35, %v2651_v36 }
  0x4e   :  { %1559 = vmatpush.bf16.msrb.mxu3 %v2206_v52  ;;  %v2379_v46 = vld [vmem:[#allocation5 + $0x1b0] sm:$0xf0]  ;;  %v3275_v47 = vld [vmem:[#allocation5 + $0x2a4] sm:$0xf]  ;;  %v2782_v48 = vor.u32 %v3343_v38, %v2779_v39 }
  0x4f   :  { %1521 = vmatpush.bf16.msrb.mxu0 %v2698_v59  ;;  %v2507_v49 = vld [vmem:[#allocation5 + $0x2b0] sm:$0xf0]  ;;  %v3307_v50 = vld [vmem:[#allocation5 + $0x3a4] sm:$0xf]  ;;  %v2382_v54 = vor.u32 %v3243_v45, %v2379_v46 }
  0x50   :  { %1534 = vmatpush.bf16.msrb.mxu1 %v2826_v63  ;;  %v2635_v51 = vld [vmem:[#allocation5 + $0x3b0] sm:$0xf0]  ;;  %v3339_v52 = vld [vmem:[#allocation5 + $0x4a4] sm:$0xf]  ;;  %v2510_v55 = vor.u32 %v3275_v47, %v2507_v49 }
  0x51   :  { %1547 = vmatpush.bf16.msrb.mxu2 %v2954_v0  ;;  %v2763_v53 = vld [vmem:[#allocation5 + $0x4b0] sm:$0xf0]  ;;  %v2638_v56 = vor.u32 %v3307_v50, %v2635_v51  ;;  %v3239_v57 = vld [vmem:[#allocation5 + $0x184] sm:$0xf] }
  0x52   :  { %1560 = vmatpush.bf16.msrb.mxu3 %v2190_v4  ;;  %v2363_v58 = vld [vmem:[#allocation5 + $0x190] sm:$0xf0]  ;;  %v3271_v59 = vld [vmem:[#allocation5 + $0x284] sm:$0xf]  ;;  %v2766_v60 = vor.u32 %v3339_v52, %v2763_v53 }
  0x53   :  { %1522 = vmatpush.bf16.msrb.mxu0 %v2682_v11  ;;  %v2491_v61 = vld [vmem:[#allocation5 + $0x290] sm:$0xf0]  ;;  %v3303_v62 = vld [vmem:[#allocation5 + $0x384] sm:$0xf]  ;;  %v2366_v2 = vor.u32 %v3239_v57, %v2363_v58 }
  0x54   :  { %1535 = vmatpush.bf16.msrb.mxu1 %v2810_v16  ;;  %v2619_v63 = vld [vmem:[#allocation5 + $0x390] sm:$0xf0]  ;;  %v3335_v0 = vld [vmem:[#allocation5 + $0x484] sm:$0xf]  ;;  %v2494_v3 = vor.u32 %v3271_v59, %v2491_v61 }
  0x55   :  { %1548 = vmatpush.bf16.msrb.mxu2 %v2938_v17  ;;  %v2747_v1 = vld [vmem:[#allocation5 + $0x490] sm:$0xf0]  ;;  %v2622_v4 = vor.u32 %v3303_v62, %v2619_v63  ;;  %v3235_v5 = vld [vmem:[#allocation5 + $0x164] sm:$0xf]  ;;  %v2289_v62 = vld [vmem:[#allocation5 + $0xe8] sm:$0xf] }
  0x56   :  { %1561 = vmatpush.bf16.msrb.mxu3 %v2174_v26  ;;  %1523 = vmatmul.bf16.vlgmr.msrb.gmra.mxu0 %v3650_v40  ;;  %v2347_v6 = vld [vmem:[#allocation5 + $0x170] sm:$0xf0]  ;;  %v3267_v7 = vld [vmem:[#allocation5 + $0x264] sm:$0xf]  ;;  %v2750_v8 = vor.u32 %v3335_v0, %v2747_v1  ;;  %v3222_v63 = vld [vmem:[#allocation5 + $0xf4] sm:$0xf0] }
  0x57   :  { %1567 = vmatpush.bf16.msra.mxu0 %v2414_v27  ;;  %1536 = vmatmul.bf16.vlgmr.msrb.gmra.mxu1 %v3652_v41  ;;  %v2475_v9 = vld [vmem:[#allocation5 + $0x270] sm:$0xf0]  ;;  %v3299_v10 = vld [vmem:[#allocation5 + $0x364] sm:$0xf]  ;;  %v2350_v14 = vor.u32 %v3235_v5, %v2347_v6 }
  0x58   :  { %1580 = vmatpush.bf16.msra.mxu1 %v2542_v28  ;;  %1549 = vmatmul.bf16.vlgmr.msrb.gmra.mxu2 %v3648_v37  ;;  %v2603_v11 = vld [vmem:[#allocation5 + $0x370] sm:$0xf0]  ;;  %v3331_v12 = vld [vmem:[#allocation5 + $0x464] sm:$0xf]  ;;  %v2478_v15 = vor.u32 %v3267_v7, %v2475_v9  ;;  %v2290_v7 = vor.u32 %v3222_v63, %v2289_v62 }
  0x59   :  { %1593 = vmatpush.bf16.msra.mxu2 %v2670_v29  ;;  %1562 = vmatmul.bf16.vlgmr.msrb.gmra.mxu3 %v3638_v19  ;;  %v2731_v13 = vld [vmem:[#allocation5 + $0x470] sm:$0xf0]  ;;  %v2606_v16 = vor.u32 %v3299_v10, %v2603_v11  ;;  %v3231_v17 = vld [vmem:[#allocation5 + $0x144] sm:$0xf] }
  0x5a   :  { %1606 = vmatpush.bf16.msra.mxu3 %v2798_v33  ;;  %v2331_v21 = vld [vmem:[#allocation5 + $0x150] sm:$0xf0]  ;;  %v3263_v23 = vld [vmem:[#allocation5 + $0x244] sm:$0xf]  ;;  %v2734_v24 = vor.u32 %v3331_v12, %v2731_v13  ;;  %v2273_v13 = vld [vmem:[#allocation5 + $0xc8] sm:$0xf] }
  0x5b   :  { %1568 = vmatpush.bf16.msra.mxu0 %v2398_v42  ;;  %v2459_v25 = vld [vmem:[#allocation5 + $0x250] sm:$0xf0]  ;;  %v3295_v26 = vld [vmem:[#allocation5 + $0x344] sm:$0xf]  ;;  %v2334_v30 = vor.u32 %v3231_v17, %v2331_v21 }
  0x5c   :  { %1581 = vmatpush.bf16.msra.mxu1 %v2526_v43  ;;  %v2587_v27 = vld [vmem:[#allocation5 + $0x350] sm:$0xf0]  ;;  %v3327_v28 = vld [vmem:[#allocation5 + $0x444] sm:$0xf]  ;;  %v2462_v31 = vor.u32 %v3263_v23, %v2459_v25 }
  0x5d   :  { %1594 = vmatpush.bf16.msra.mxu2 %v2654_v44  ;;  %v2715_v29 = vld [vmem:[#allocation5 + $0x450] sm:$0xf0]  ;;  %v2590_v32 = vor.u32 %v3295_v26, %v2587_v27  ;;  %v3227_v33 = vld [vmem:[#allocation5 + $0x124] sm:$0xf] }
  0x5e   :  { %1607 = vmatpush.bf16.msra.mxu3 %v2782_v48  ;;  %v2315_v34 = vld [vmem:[#allocation5 + $0x130] sm:$0xf0]  ;;  %v3259_v35 = vld [vmem:[#allocation5 + $0x224] sm:$0xf]  ;;  %v2718_v36 = vor.u32 %v3327_v28, %v2715_v29  ;;  %v2257_v29 = vld [vmem:[#allocation5 + $0xa8] sm:$0xf] }
  0x5f   :  { %1569 = vmatpush.bf16.msra.mxu0 %v2382_v54  ;;  %v2443_v38 = vld [vmem:[#allocation5 + $0x230] sm:$0xf0]  ;;  %v3291_v39 = vld [vmem:[#allocation5 + $0x324] sm:$0xf]  ;;  %v2318_v45 = vor.u32 %v3227_v33, %v2315_v34 }
  0x60   :  { %1582 = vmatpush.bf16.msra.mxu1 %v2510_v55  ;;  %v2571_v42 = vld [vmem:[#allocation5 + $0x330] sm:$0xf0]  ;;  %v3323_v43 = vld [vmem:[#allocation5 + $0x424] sm:$0xf]  ;;  %v2446_v48 = vor.u32 %v3259_v35, %v2443_v38 }
  0x61   :  { %1595 = vmatpush.bf16.msra.mxu2 %v2638_v56  ;;  %v2699_v44 = vld [vmem:[#allocation5 + $0x430] sm:$0xf0]  ;;  %v3223_v46 = vld [vmem:[#allocation5 + $0x104] sm:$0xf]  ;;  %v2574_v49 = vor.u32 %v3291_v39, %v2571_v42 }
  0x62   :  { %1608 = vmatpush.bf16.msra.mxu3 %v2766_v60  ;;  %v2299_v47 = vld [vmem:[#allocation5 + $0x110] sm:$0xf0]  ;;  %v3255_v50 = vld [vmem:[#allocation5 + $0x204] sm:$0xf]  ;;  %v2702_v53 = vor.u32 %v3323_v43, %v2699_v44  ;;  %v2241_v44 = vld [vmem:[#allocation5 + $0x88] sm:$0xf] }
  0x63   :  { %1570 = vmatpush.bf16.msra.mxu0 %v2366_v2  ;;  %v2427_v51 = vld [vmem:[#allocation5 + $0x210] sm:$0xf0]  ;;  %v3287_v52 = vld [vmem:[#allocation5 + $0x304] sm:$0xf]  ;;  %v2302_v60 = vor.u32 %v3223_v46, %v2299_v47  ;;  %v2417_v2 = vld [vmem:[#allocation5 + $0x1e8] sm:$0xf] }
  0x64   :  { %1583 = vmatpush.bf16.msra.mxu1 %v2494_v3  ;;  %v2555_v54 = vld [vmem:[#allocation5 + $0x310] sm:$0xf0]  ;;  %v3319_v55 = vld [vmem:[#allocation5 + $0x404] sm:$0xf]  ;;  %v2430_v0 = vor.u32 %v3255_v50, %v2427_v51  ;;  %v3254_v3 = vld [vmem:[#allocation5 + $0x1f4] sm:$0xf0] }
  0x65   :  { %1596 = vmatpush.bf16.msra.mxu2 %v2622_v4  ;;  %v2683_v56 = vld [vmem:[#allocation5 + $0x410] sm:$0xf0]  ;;  %v3379_v57 = vld [vmem:[#allocation5 + $0x5e4] sm:$0xf]  ;;  %v2558_v1 = vor.u32 %v3287_v52, %v2555_v54  ;;  %v2418_v11 = vor.u32 %v3254_v3, %v2417_v2  ;;  %v2369_v46 = vld [vmem:[#allocation5 + $0x188] sm:$0xf] }
  0x66   :  { %1609 = vmatpush.bf16.msra.mxu3 %v2750_v8  ;;  %v2923_v58 = vld [vmem:[#allocation5 + $0x5f0] sm:$0xf0]  ;;  %v3411_v59 = vld [vmem:[#allocation5 + $0x6e4] sm:$0xf]  ;;  %v2686_v4 = vor.u32 %v3319_v55, %v2683_v56  ;;  %v3242_v47 = vld [vmem:[#allocation5 + $0x194] sm:$0xf0] }
  0x67   :  { %1571 = vmatpush.bf16.msra.mxu0 %v2350_v14  ;;  %v3051_v61 = vld [vmem:[#allocation5 + $0x6f0] sm:$0xf0]  ;;  %v2926_v5 = vor.u32 %v3379_v57, %v2923_v58  ;;  %v3375_v8 = vld [vmem:[#allocation5 + $0x5c4] sm:$0xf]  ;;  %v3218_v14 = vld [vmem:[#allocation5 + $0xd4] sm:$0xf0]  ;;  %v2370_v54 = vor.u32 %v3242_v47, %v2369_v46 }
  0x68   :  { %1584 = vmatpush.bf16.msra.mxu1 %v2478_v15  ;;  %v3054_v6 = vor.u32 %v3411_v59, %v3051_v61  ;;  %v2907_v9 = vld [vmem:[#allocation5 + $0x5d0] sm:$0xf0]  ;;  %v3407_v10 = vld [vmem:[#allocation5 + $0x6c4] sm:$0xf]  ;;  %v2401_v15 = vld [vmem:[#allocation5 + $0x1c8] sm:$0xf]  ;;  %v2274_v23 = vor.u32 %v3218_v14, %v2273_v13 }
  0x69   :  { %1597 = vmatpush.bf16.msra.mxu2 %v2606_v16  ;;  %v3035_v12 = vld [vmem:[#allocation5 + $0x6d0] sm:$0xf0]  ;;  %v3250_v16 = vld [vmem:[#allocation5 + $0x1d4] sm:$0xf0]  ;;  %v2910_v17 = vor.u32 %v3375_v8, %v2907_v9  ;;  %v3403_v26 = vld [vmem:[#allocation5 + $0x6a4] sm:$0xf] }
  0x6a   :  { %1610 = vmatpush.bf16.msra.mxu3 %v2734_v24  ;;  %v3038_v21 = vor.u32 %v3407_v10, %v3035_v12  ;;  %v3371_v24 = vld [vmem:[#allocation5 + $0x5a4] sm:$0xf]  ;;  %v2891_v25 = vld [vmem:[#allocation5 + $0x5b0] sm:$0xf0]  ;;  %v2402_v27 = vor.u32 %v3250_v16, %v2401_v15  ;;  %v2225_v56 = vld [vmem:[#allocation5 + $0x68] sm:$0xf] }
  0x6b   :  { %1572 = vmatpush.bf16.msra.mxu0 %v2334_v30  ;;  %v3019_v28 = vld [vmem:[#allocation5 + $0x6b0] sm:$0xf0]  ;;  %v3214_v30 = vld [vmem:[#allocation5 + $0xb4] sm:$0xf0]  ;;  %v2894_v33 = vor.u32 %v3371_v24, %v2891_v25  ;;  %v3399_v39 = vld [vmem:[#allocation5 + $0x684] sm:$0xf] }
  0x6c   :  { %1585 = vmatpush.bf16.msra.mxu1 %v2462_v31  ;;  %v2385_v31 = vld [vmem:[#allocation5 + $0x1a8] sm:$0xf]  ;;  %v3022_v34 = vor.u32 %v3403_v26, %v3019_v28  ;;  %v2258_v35 = vor.u32 %v3214_v30, %v2257_v29  ;;  %v2875_v38 = vld [vmem:[#allocation5 + $0x590] sm:$0xf0]  ;;  %v3363_v51 = vld [vmem:[#allocation5 + $0x564] sm:$0xf] }
  0x6d   :  { %1598 = vmatpush.bf16.msra.mxu2 %v2590_v32  ;;  %v3246_v32 = vld [vmem:[#allocation5 + $0x1b4] sm:$0xf0]  ;;  %v3003_v43 = vld [vmem:[#allocation5 + $0x690] sm:$0xf0]  ;;  %v2353_v58 = vld [vmem:[#allocation5 + $0x168] sm:$0xf] }
  0x6e   :  { %1611 = vmatpush.bf16.msra.mxu3 %v2718_v36  ;;  %v3367_v36 = vld [vmem:[#allocation5 + $0x584] sm:$0xf]  ;;  %v2386_v42 = vor.u32 %v3246_v32, %v2385_v31  ;;  %v2859_v52 = vld [vmem:[#allocation5 + $0x570] sm:$0xf0]  ;;  %v3206_v57 = vld [vmem:[#allocation5 + $0x74] sm:$0xf0] }
  0x6f   :  { %1573 = vmatpush.bf16.msra.mxu0 %v2318_v45  ;;  %v3210_v45 = vld [vmem:[#allocation5 + $0x94] sm:$0xf0]  ;;  %v2987_v55 = vld [vmem:[#allocation5 + $0x670] sm:$0xf0]  ;;  %v2226_v62 = vor.u32 %v3206_v57, %v2225_v56  ;;  %v3359_v63 = vld [vmem:[#allocation5 + $0x544] sm:$0xf] }
  0x70   :  { %1586 = vmatpush.bf16.msra.mxu1 %v2446_v48  ;;  %v2878_v48 = vor.u32 %v3367_v36, %v2875_v38  ;;  %v2242_v50 = vor.u32 %v3210_v45, %v2241_v44  ;;  %v3238_v59 = vld [vmem:[#allocation5 + $0x174] sm:$0xf0]  ;;  %v2971_v3 = vld [vmem:[#allocation5 + $0x650] sm:$0xf0]  ;;  %v3387_v13 = vld [vmem:[#allocation5 + $0x624] sm:$0xf] }
  0x71   :  { %1599 = vmatpush.bf16.msra.mxu2 %v2574_v49  ;;  %v3006_v49 = vor.u32 %v3399_v39, %v3003_v43  ;;  %v2354_v2 = vor.u32 %v3238_v59, %v2353_v58  ;;  %v2827_v12 = vld [vmem:[#allocation5 + $0x530] sm:$0xf0]  ;;  %v2193_v16 = vld [vmem:[#allocation5 + $0x28] sm:$0xf]  ;;  %v3351_v25 = vld [vmem:[#allocation5 + $0x504] sm:$0xf] }
  0x72   :  { %1612 = vmatpush.bf16.msra.mxu3 %v2702_v53  ;;  %v3395_v53 = vld [vmem:[#allocation5 + $0x664] sm:$0xf]  ;;  %v2955_v15 = vld [vmem:[#allocation5 + $0x630] sm:$0xf0]  ;;  %v2177_v31 = vld [vmem:[#allocation5 + $0x8] sm:$0xf] }
  0x73   :  { %1574 = vmatpush.bf16.msra.mxu0 %v2302_v60  ;;  %v2862_v60 = vor.u32 %v3363_v51, %v2859_v52  ;;  %v2990_v61 = vor.u32 %v3395_v53, %v2987_v55  ;;  %v2811_v26 = vld [vmem:[#allocation5 + $0x510] sm:$0xf0]  ;;  %v3383_v29 = vld [vmem:[#allocation5 + $0x604] sm:$0xf]  ;;  %v2545_v36 = vld [vmem:[#allocation5 + $0x2e8] sm:$0xf] }
  0x74   :  { %1587 = vmatpush.bf16.msra.mxu1 %v2430_v0  ;;  %v2843_v0 = vld [vmem:[#allocation5 + $0x550] sm:$0xf0]  ;;  %v3286_v38 = vld [vmem:[#allocation5 + $0x2f4] sm:$0xf0]  ;;  %v2673_v39 = vld [vmem:[#allocation5 + $0x3e8] sm:$0xf] }
  0x75   :  { %1600 = vmatpush.bf16.msra.mxu2 %v2558_v1  ;;  %v3391_v1 = vld [vmem:[#allocation5 + $0x644] sm:$0xf]  ;;  %v2846_v8 = vor.u32 %v3359_v63, %v2843_v0  ;;  %v2939_v30 = vld [vmem:[#allocation5 + $0x610] sm:$0xf0]  ;;  %v3318_v43 = vld [vmem:[#allocation5 + $0x3f4] sm:$0xf0]  ;;  %v2546_v51 = vor.u32 %v3286_v38, %v2545_v36 }
  0x76   :  { %1613 = vmatpush.bf16.msra.mxu3 %v2686_v4  ;;  %1575 = vmatmul.bf16.vlgmr.msra.gmra.mxu0 %v3642_v22  ;;  %v2209_v4 = vld [vmem:[#allocation5 + $0x48] sm:$0xf]  ;;  %v2974_v9 = vor.u32 %v3391_v1, %v2971_v3  ;;  %v3350_v45 = vld [vmem:[#allocation5 + $0x4f4] sm:$0xf0]  ;;  %v2942_v46 = vor.u32 %v3383_v29, %v2939_v30  ;;  %v2674_v52 = vor.u32 %v3318_v43, %v2673_v39 }
  0x77   :  { %1619 = vmatpush.bf16.msrb.mxu0 %v2926_v5  ;;  %1588 = vmatmul.bf16.vlgmr.msra.gmra.mxu1 %v3636_v18  ;;  %v3202_v5 = vld [vmem:[#allocation5 + $0x54] sm:$0xf0]  ;;  %v2801_v44 = vld [vmem:[#allocation5 + $0x4e8] sm:$0xf] }
  0x78   :  { %1632 = vmatpush.bf16.msrb.mxu1 %v3054_v6  ;;  %1601 = vmatmul.bf16.vlgmr.msra.gmra.mxu2 %v3640_v20  ;;  %v2337_v6 = vld [vmem:[#allocation5 + $0x148] sm:$0xf]  ;;  %v2210_v10 = vor.u32 %v3202_v5, %v2209_v4  ;;  %v2802_v53 = vor.u32 %v3350_v45, %v2801_v44  ;;  %v3282_v55 = vld [vmem:[#allocation5 + $0x2d4] sm:$0xf0] }
  0x79   :  { %1645 = vmatpush.bf16.msrb.mxu2 %v2290_v7  ;;  %1614 = vmatmul.bf16.vlgmr.msra.gmra.mxu3 %v3650_v40  ;;  %v3234_v7 = vld [vmem:[#allocation5 + $0x154] sm:$0xf0]  ;;  %v2657_v56 = vld [vmem:[#allocation5 + $0x3c8] sm:$0xf] }
  0x7a   :  { %1658 = vmatpush.bf16.msrb.mxu3 %v2418_v11  ;;  %v3355_v11 = vld [vmem:[#allocation5 + $0x524] sm:$0xf]  ;;  %v2338_v14 = vor.u32 %v3234_v7, %v2337_v6  ;;  %v3314_v58 = vld [vmem:[#allocation5 + $0x3d4] sm:$0xf0]  ;;  %v2785_v59 = vld [vmem:[#allocation5 + $0x4c8] sm:$0xf] }
  0x7b   :  { %1620 = vmatpush.bf16.msrb.mxu0 %v2910_v17  ;;  %v3198_v17 = vld [vmem:[#allocation5 + $0x34] sm:$0xf0]  ;;  %v2830_v24 = vor.u32 %v3355_v11, %v2827_v12  ;;  %v2658_v0 = vor.u32 %v3314_v58, %v2657_v56  ;;  %v2641_v4 = vld [vmem:[#allocation5 + $0x3a8] sm:$0xf] }
  0x7c   :  { %1633 = vmatpush.bf16.msrb.mxu1 %v3038_v21  ;;  %v2321_v21 = vld [vmem:[#allocation5 + $0x128] sm:$0xf]  ;;  %v2194_v28 = vor.u32 %v3198_v17, %v2193_v16  ;;  %v3278_v3 = vld [vmem:[#allocation5 + $0x2b4] sm:$0xf0] }
  0x7d   :  { %1646 = vmatpush.bf16.msrb.mxu2 %v2274_v23  ;;  %v3230_v23 = vld [vmem:[#allocation5 + $0x134] sm:$0xf0]  ;;  %v2769_v7 = vld [vmem:[#allocation5 + $0x4a8] sm:$0xf] }
  0x7e   :  { %1659 = vmatpush.bf16.msrb.mxu3 %v2402_v27  ;;  %v2958_v27 = vor.u32 %v3387_v13, %v2955_v15  ;;  %v2322_v32 = vor.u32 %v3230_v23, %v2321_v21  ;;  %v3310_v6 = vld [vmem:[#allocation5 + $0x3b4] sm:$0xf0]  ;;  %v2625_v16 = vld [vmem:[#allocation5 + $0x388] sm:$0xf] }
  0x7f   :  { %1621 = vmatpush.bf16.msrb.mxu0 %v2894_v33  ;;  %v3194_v33 = vld [vmem:[#allocation5 + $0x14] sm:$0xf0]  ;;  %v2642_v12 = vor.u32 %v3310_v6, %v2641_v4  ;;  %v2753_v23 = vld [vmem:[#allocation5 + $0x488] sm:$0xf] }
  0x80   :  { %1634 = vmatpush.bf16.msrb.mxu1 %v3022_v34  ;;  %v2305_v34 = vld [vmem:[#allocation5 + $0x108] sm:$0xf]  ;;  %v2178_v47 = vor.u32 %v3194_v33, %v2177_v31  ;;  %v3274_v15 = vld [vmem:[#allocation5 + $0x294] sm:$0xf0] }
  0x81   :  { %1647 = vmatpush.bf16.msrb.mxu2 %v2258_v35  ;;  %v3226_v35 = vld [vmem:[#allocation5 + $0x114] sm:$0xf0]  ;;  %v2481_v30 = vld [vmem:[#allocation5 + $0x268] sm:$0xf] }
  0x82   :  { %1660 = vmatpush.bf16.msrb.mxu3 %v2386_v42  ;;  %v2814_v42 = vor.u32 %v3351_v25, %v2811_v26  ;;  %v3306_v21 = vld [vmem:[#allocation5 + $0x394] sm:$0xf0]  ;;  %v2881_v25 = vld [vmem:[#allocation5 + $0x588] sm:$0xf] }
  0x83   :  { %1622 = vmatpush.bf16.msrb.mxu0 %v2878_v48  ;;  %v2929_v48 = vld [vmem:[#allocation5 + $0x5e8] sm:$0xf]  ;;  %v3370_v26 = vld [vmem:[#allocation5 + $0x594] sm:$0xf0] }
  0x84   :  { %1635 = vmatpush.bf16.msrb.mxu1 %v3006_v49  ;;  %v3382_v49 = vld [vmem:[#allocation5 + $0x5f4] sm:$0xf0]  ;;  %v2882_v33 = vor.u32 %v3370_v26, %v2881_v25  ;;  %v2865_v38 = vld [vmem:[#allocation5 + $0x568] sm:$0xf] }
  0x85   :  { %1648 = vmatpush.bf16.msrb.mxu2 %v2242_v50  ;;  %v2306_v50 = vor.u32 %v3226_v35, %v2305_v34  ;;  %v2930_v57 = vor.u32 %v3382_v49, %v2929_v48  ;;  %v3270_v31 = vld [vmem:[#allocation5 + $0x274] sm:$0xf0]  ;;  %v2737_v35 = vld [vmem:[#allocation5 + $0x468] sm:$0xf] }
  0x86   :  { %1661 = vmatpush.bf16.msrb.mxu3 %v2370_v54  ;;  %v2529_v54 = vld [vmem:[#allocation5 + $0x2c8] sm:$0xf]  ;;  %v3302_v34 = vld [vmem:[#allocation5 + $0x374] sm:$0xf0] }
  0x87   :  { %1623 = vmatpush.bf16.msrb.mxu0 %v2862_v60  ;;  %v3346_v60 = vld [vmem:[#allocation5 + $0x4d4] sm:$0xf0]  ;;  %v2530_v63 = vor.u32 %v3282_v55, %v2529_v54  ;;  %v2465_v45 = vld [vmem:[#allocation5 + $0x248] sm:$0xf] }
  0x88   :  { %1636 = vmatpush.bf16.msrb.mxu1 %v2990_v61  ;;  %v2913_v61 = vld [vmem:[#allocation5 + $0x5c8] sm:$0xf]  ;;  %v2786_v1 = vor.u32 %v3346_v60, %v2785_v59  ;;  %v3334_v36 = vld [vmem:[#allocation5 + $0x474] sm:$0xf0] }
  0x89   :  { %1649 = vmatpush.bf16.msrb.mxu2 %v2226_v62  ;;  %v3378_v62 = vld [vmem:[#allocation5 + $0x5d4] sm:$0xf0]  ;;  %v2738_v44 = vor.u32 %v3334_v36, %v2737_v35  ;;  %v2577_v59 = vld [vmem:[#allocation5 + $0x328] sm:$0xf]  ;;  %v3216_v35 = vld [vmem:[#allocation5 + $0xcc] sm:$0xf] }
  0x8a   :  { %1662 = vmatpush.bf16.msrb.mxu3 %v2354_v2  ;;  %v2513_v2 = vld [vmem:[#allocation5 + $0x2a8] sm:$0xf]  ;;  %v2914_v5 = vor.u32 %v3378_v62, %v2913_v61  ;;  %v3366_v39 = vld [vmem:[#allocation5 + $0x574] sm:$0xf0] }
  0x8b   :  { %1624 = vmatpush.bf16.msrb.mxu0 %v2846_v8  ;;  %v3342_v8 = vld [vmem:[#allocation5 + $0x4b4] sm:$0xf0]  ;;  %v2514_v11 = vor.u32 %v3278_v3, %v2513_v2  ;;  %v2866_v48 = vor.u32 %v3366_v39, %v2865_v38  ;;  %v2705_v62 = vld [vmem:[#allocation5 + $0x428] sm:$0xf]  ;;  %v2275_v38 = vld [vmem:[#allocation5 + $0xd8] sm:$0xf0] }
  0x8c   :  { %1637 = vmatpush.bf16.msrb.mxu1 %v2974_v9  ;;  %v2897_v9 = vld [vmem:[#allocation5 + $0x5a8] sm:$0xf]  ;;  %v2770_v13 = vor.u32 %v3342_v8, %v2769_v7  ;;  %v3298_v49 = vld [vmem:[#allocation5 + $0x354] sm:$0xf0]  ;;  %v3248_v39 = vld [vmem:[#allocation5 + $0x1cc] sm:$0xf] }
  0x8d   :  { %1650 = vmatpush.bf16.msrb.mxu2 %v2210_v10  ;;  %v3374_v10 = vld [vmem:[#allocation5 + $0x5b4] sm:$0xf0]  ;;  %v2433_v3 = vld [vmem:[#allocation5 + $0x208] sm:$0xf] }
  0x8e   :  { %1663 = vmatpush.bf16.msrb.mxu3 %v2338_v14  ;;  %v2497_v14 = vld [vmem:[#allocation5 + $0x288] sm:$0xf]  ;;  %v2898_v17 = vor.u32 %v3374_v10, %v2897_v9  ;;  %v3262_v58 = vld [vmem:[#allocation5 + $0x234] sm:$0xf0] }
  0x8f   :  { %1625 = vmatpush.bf16.msrb.mxu0 %v2830_v24  ;;  %v3338_v24 = vld [vmem:[#allocation5 + $0x494] sm:$0xf0]  ;;  %v2561_v7 = vld [vmem:[#allocation5 + $0x308] sm:$0xf] }
  0x90   :  { %1638 = vmatpush.bf16.msrb.mxu1 %v2958_v27  ;;  %v2498_v27 = vor.u32 %v3274_v15, %v2497_v14  ;;  %v2754_v29 = vor.u32 %v3338_v24, %v2753_v23  ;;  %v3294_v61 = vld [vmem:[#allocation5 + $0x334] sm:$0xf0]  ;;  %v2689_v9 = vld [vmem:[#allocation5 + $0x408] sm:$0xf]  ;;  %v3252_v23 = vld [vmem:[#allocation5 + $0x1ec] sm:$0xf] }
  0x91   :  { %1651 = vmatpush.bf16.msrb.mxu2 %v2194_v28  ;;  %v2626_v28 = vor.u32 %v3306_v21, %v2625_v16  ;;  %v3258_v4 = vld [vmem:[#allocation5 + $0x214] sm:$0xf0]  ;;  %v3057_v14 = vld [vmem:[#allocation5 + $0x6e8] sm:$0xf]  ;;  %v3220_v16 = vld [vmem:[#allocation5 + $0xec] sm:$0xf] }
  0x92   :  { %1664 = vmatpush.bf16.msrb.mxu3 %v2322_v32  ;;  %v2609_v32 = vld [vmem:[#allocation5 + $0x368] sm:$0xf]  ;;  %v3290_v8 = vld [vmem:[#allocation5 + $0x314] sm:$0xf0]  ;;  %v2291_v21 = vld [vmem:[#allocation5 + $0xf8] sm:$0xf0] }
  0x93   :  { %1626 = vmatpush.bf16.msrb.mxu0 %v2814_v42  ;;  %v2482_v42 = vor.u32 %v3270_v31, %v2481_v30  ;;  %v2610_v43 = vor.u32 %v3302_v34, %v2609_v32  ;;  %v3414_v15 = vld [vmem:[#allocation5 + $0x6f4] sm:$0xf0]  ;;  %v2419_v24 = vld [vmem:[#allocation5 + $0x1f8] sm:$0xf0]  ;;  %v2562_v25 = vor.u32 %v3290_v8, %v2561_v7  ;;  %v2294_v31 = vor.u32 %v3220_v16, %v2291_v21  ;;  %v2993_v8 = vld [vmem:[#allocation5 + $0x668] sm:$0xf] }
  0x94   :  { %1639 = vmatpush.bf16.msrb.mxu1 %v2942_v46  ;;  %v3266_v46 = vld [vmem:[#allocation5 + $0x254] sm:$0xf0]  ;;  %v3058_v30 = vor.u32 %v3414_v15, %v3057_v14  ;;  %v2422_v32 = vor.u32 %v3252_v23, %v2419_v24  ;;  %v2355_v14 = vld [vmem:[#allocation5 + $0x178] sm:$0xf0]  ;;  %v3268_v15 = vld [vmem:[#allocation5 + $0x26c] sm:$0xf] }
  0x95   :  { %1652 = vmatpush.bf16.msrb.mxu2 %v2178_v47  ;;  %v2593_v47 = vld [vmem:[#allocation5 + $0x348] sm:$0xf]  ;;  %v2466_v54 = vor.u32 %v3266_v46, %v2465_v45  ;;  %v3410_v34 = vld [vmem:[#allocation5 + $0x6d4] sm:$0xf0]  ;;  %v2278_v46 = vor.u32 %v3216_v35, %v2275_v38  ;;  %v2483_v16 = vld [vmem:[#allocation5 + $0x278] sm:$0xf0] }
  0x96   :  { %1665 = vmatpush.bf16.msrb.mxu3 %v2306_v50  ;;  %1627 = vmatmul.bf16.vlgmr.msrb.gmra.mxu0 %v3652_v41  ;;  %v2721_v50 = vld [vmem:[#allocation5 + $0x448] sm:$0xf]  ;;  %v2594_v55 = vor.u32 %v3298_v49, %v2593_v47  ;;  %v3406_v49 = vld [vmem:[#allocation5 + $0x6b4] sm:$0xf0] }
  0x97   :  { %1671 = vmatpush.bf16.msra.mxu0 %v2546_v51  ;;  %1640 = vmatmul.bf16.vlgmr.msrb.gmra.mxu1 %v3648_v37  ;;  %v3330_v51 = vld [vmem:[#allocation5 + $0x454] sm:$0xf0]  ;;  %v2977_v24 = vld [vmem:[#allocation5 + $0x648] sm:$0xf] }
  0x98   :  { %1684 = vmatpush.bf16.msra.mxu1 %v2674_v52  ;;  %1653 = vmatmul.bf16.vlgmr.msrb.gmra.mxu2 %v3638_v19  ;;  %v2849_v52 = vld [vmem:[#allocation5 + $0x548] sm:$0xf]  ;;  %v2722_v56 = vor.u32 %v3330_v51, %v2721_v50  ;;  %v3212_v50 = vld [vmem:[#allocation5 + $0xac] sm:$0xf] }
  0x99   :  { %1697 = vmatpush.bf16.msra.mxu2 %v2802_v53  ;;  %1666 = vmatmul.bf16.vlgmr.msrb.gmra.mxu3 %v3642_v22  ;;  %v3362_v53 = vld [vmem:[#allocation5 + $0x554] sm:$0xf0]  ;;  %v2961_v38 = vld [vmem:[#allocation5 + $0x628] sm:$0xf] }
  0x9a   :  { %1710 = vmatpush.bf16.msra.mxu3 %v2930_v57  ;;  %v2449_v57 = vld [vmem:[#allocation5 + $0x228] sm:$0xf]  ;;  %v2850_v60 = vor.u32 %v3362_v53, %v2849_v52  ;;  %v2259_v52 = vld [vmem:[#allocation5 + $0xb8] sm:$0xf0]  ;;  %v3244_v53 = vld [vmem:[#allocation5 + $0x1ac] sm:$0xf] }
  0x9b   :  { %1672 = vmatpush.bf16.msra.mxu0 %v2530_v63  ;;  %v3326_v63 = vld [vmem:[#allocation5 + $0x434] sm:$0xf0]  ;;  %v2450_v2 = vor.u32 %v3262_v58, %v2449_v57  ;;  %v2262_v58 = vor.u32 %v3212_v50, %v2259_v52 }
  0x9c   :  { %1685 = vmatpush.bf16.msra.mxu1 %v2658_v0  ;;  %v2833_v0 = vld [vmem:[#allocation5 + $0x528] sm:$0xf]  ;;  %v2706_v6 = vor.u32 %v3326_v63, %v2705_v62  ;;  %v3208_v62 = vld [vmem:[#allocation5 + $0x8c] sm:$0xf]  ;;  %v3386_v52 = vld [vmem:[#allocation5 + $0x614] sm:$0xf0] }
  0x9d   :  { %1698 = vmatpush.bf16.msra.mxu2 %v2786_v1  ;;  %v3358_v1 = vld [vmem:[#allocation5 + $0x534] sm:$0xf0] }
  0x9e   :  { %1711 = vmatpush.bf16.msra.mxu3 %v2914_v5  ;;  %v2578_v5 = vor.u32 %v3294_v61, %v2577_v59  ;;  %v2834_v10 = vor.u32 %v3358_v1, %v2833_v0  ;;  %v3402_v61 = vld [vmem:[#allocation5 + $0x694] sm:$0xf0]  ;;  %v2243_v0 = vld [vmem:[#allocation5 + $0x98] sm:$0xf0]  ;;  %v3240_v1 = vld [vmem:[#allocation5 + $0x18c] sm:$0xf] }
  0x9f   :  { %1673 = vmatpush.bf16.msra.mxu0 %v2514_v11  ;;  %v3322_v11 = vld [vmem:[#allocation5 + $0x414] sm:$0xf0] }
  0xa0   :  { %1686 = vmatpush.bf16.msra.mxu1 %v2642_v12  ;;  %v2817_v12 = vld [vmem:[#allocation5 + $0x508] sm:$0xf]  ;;  %v2690_v26 = vor.u32 %v3322_v11, %v2689_v9  ;;  %v3398_v9 = vld [vmem:[#allocation5 + $0x674] sm:$0xf0] }
  0xa1   :  { %1699 = vmatpush.bf16.msra.mxu2 %v2770_v13  ;;  %v3354_v13 = vld [vmem:[#allocation5 + $0x514] sm:$0xf0] }
  0xa2   :  { %1712 = vmatpush.bf16.msra.mxu3 %v2898_v17  ;;  %v2434_v17 = vor.u32 %v3258_v4, %v2433_v3  ;;  %v3272_v3 = vld [vmem:[#allocation5 + $0x28c] sm:$0xf]  ;;  %v2499_v4 = vld [vmem:[#allocation5 + $0x298] sm:$0xf0] }
  0xa3   :  { %1674 = vmatpush.bf16.msra.mxu0 %v2498_v27  ;;  %v3284_v27 = vld [vmem:[#allocation5 + $0x2ec] sm:$0xf]  ;;  %v2502_v11 = vor.u32 %v3272_v3, %v2499_v4  ;;  %v2803_v4 = vld [vmem:[#allocation5 + $0x4f8] sm:$0xf0] }
  0xa4   :  { %1687 = vmatpush.bf16.msra.mxu1 %v2626_v28  ;;  %v2547_v28 = vld [vmem:[#allocation5 + $0x2f8] sm:$0xf0] }
  0xa5   :  { %1700 = vmatpush.bf16.msra.mxu2 %v2754_v29  ;;  %v2818_v29 = vor.u32 %v3354_v13, %v2817_v12  ;;  %v2550_v36 = vor.u32 %v3284_v27, %v2547_v28  ;;  %v2227_v12 = vld [vmem:[#allocation5 + $0x78] sm:$0xf0]  ;;  %v3236_v13 = vld [vmem:[#allocation5 + $0x16c] sm:$0xf]  ;;  %v2486_v27 = vor.u32 %v3268_v15, %v2483_v16 }
  0xa6   :  { %1713 = vmatpush.bf16.msra.mxu3 %v2882_v33  ;;  %v3041_v33 = vld [vmem:[#allocation5 + $0x6c8] sm:$0xf]  ;;  %v2358_v23 = vor.u32 %v3236_v13, %v2355_v14  ;;  %v2211_v28 = vld [vmem:[#allocation5 + $0x58] sm:$0xf0] }
  0xa7   :  { %1675 = vmatpush.bf16.msra.mxu0 %v2482_v42  ;;  %v2403_v42 = vld [vmem:[#allocation5 + $0x1d8] sm:$0xf0]  ;;  %v3042_v45 = vor.u32 %v3410_v34, %v3041_v33 }
  0xa8   :  { %1688 = vmatpush.bf16.msra.mxu1 %v2610_v43  ;;  %v3280_v43 = vld [vmem:[#allocation5 + $0x2cc] sm:$0xf]  ;;  %v2406_v47 = vor.u32 %v3248_v39, %v2403_v42  ;;  %v3390_v39 = vld [vmem:[#allocation5 + $0x634] sm:$0xf0] }
  0xa9   :  { %1701 = vmatpush.bf16.msra.mxu2 %v2738_v44  ;;  %v2531_v44 = vld [vmem:[#allocation5 + $0x2d8] sm:$0xf0]  ;;  %v3196_v42 = vld [vmem:[#allocation5 + $0x2c] sm:$0xf]  ;;  %v2962_v50 = vor.u32 %v3390_v39, %v2961_v38 }
  0xaa   :  { %1714 = vmatpush.bf16.msra.mxu3 %v2866_v48  ;;  %v3025_v48 = vld [vmem:[#allocation5 + $0x6a8] sm:$0xf]  ;;  %v2534_v51 = vor.u32 %v3280_v43, %v2531_v44  ;;  %v2643_v38 = vld [vmem:[#allocation5 + $0x3b8] sm:$0xf0]  ;;  %v3340_v39 = vld [vmem:[#allocation5 + $0x4ac] sm:$0xf] }
  0xab   :  { %1676 = vmatpush.bf16.msra.mxu0 %v2466_v54  ;;  %v2387_v54 = vld [vmem:[#allocation5 + $0x1b8] sm:$0xf0]  ;;  %v3026_v57 = vor.u32 %v3406_v49, %v3025_v48  ;;  %v3260_v48 = vld [vmem:[#allocation5 + $0x22c] sm:$0xf] }
  0xac   :  { %1689 = vmatpush.bf16.msra.mxu1 %v2594_v55  ;;  %v3276_v55 = vld [vmem:[#allocation5 + $0x2ac] sm:$0xf]  ;;  %v2390_v59 = vor.u32 %v3244_v53, %v2387_v54  ;;  %v2451_v49 = vld [vmem:[#allocation5 + $0x238] sm:$0xf0] }
  0xad   :  { %1702 = vmatpush.bf16.msra.mxu2 %v2722_v56  ;;  %v2515_v56 = vld [vmem:[#allocation5 + $0x2b8] sm:$0xf0] }
  0xae   :  { %1715 = vmatpush.bf16.msra.mxu3 %v2850_v60  ;;  %v3009_v60 = vld [vmem:[#allocation5 + $0x688] sm:$0xf]  ;;  %v2518_v63 = vor.u32 %v3276_v55, %v2515_v56  ;;  %v3192_v55 = vld [vmem:[#allocation5 + $0xc] sm:$0xf]  ;;  %v2179_v56 = vld [vmem:[#allocation5 + $0x18] sm:$0xf0] }
  0xaf   :  { %1677 = vmatpush.bf16.msra.mxu0 %v2450_v2  ;;  %v2371_v2 = vld [vmem:[#allocation5 + $0x198] sm:$0xf0] }
  0xb0   :  { %1690 = vmatpush.bf16.msra.mxu1 %v2578_v5  ;;  %v3010_v5 = vor.u32 %v3402_v61, %v3009_v60  ;;  %v2374_v7 = vor.u32 %v3240_v1, %v2371_v2  ;;  %v2307_v60 = vld [vmem:[#allocation5 + $0x118] sm:$0xf0]  ;;  %v3256_v61 = vld [vmem:[#allocation5 + $0x20c] sm:$0xf] }
  0xb1   :  { %1703 = vmatpush.bf16.msra.mxu2 %v2706_v6  ;;  %v2246_v6 = vor.u32 %v3208_v62, %v2243_v0  ;;  %v2435_v62 = vld [vmem:[#allocation5 + $0x218] sm:$0xf0]  ;;  %v3316_v0 = vld [vmem:[#allocation5 + $0x3ec] sm:$0xf] }
  0xb2   :  { %1716 = vmatpush.bf16.msra.mxu3 %v2834_v10  ;;  %v3204_v10 = vld [vmem:[#allocation5 + $0x6c] sm:$0xf]  ;;  %v2675_v1 = vld [vmem:[#allocation5 + $0x3f8] sm:$0xf0]  ;;  %v2438_v13 = vor.u32 %v3256_v61, %v2435_v62 }
  0xb3   :  { %1678 = vmatpush.bf16.msra.mxu0 %v2434_v17  ;;  %v2994_v17 = vor.u32 %v3398_v9, %v2993_v8  ;;  %v2230_v21 = vor.u32 %v3204_v10, %v2227_v12  ;;  %v3670_v34 = vpop.f32.mrf.mxu0  ;;  %v3348_v2 = vld [vmem:[#allocation5 + $0x4ec] sm:$0xf]  ;;  %v2182_v8 = vor.u32 %v3192_v55, %v2179_v56  ;;  %v2678_v14 = vor.u32 %v3316_v0, %v2675_v1  ;;  %v2755_v56 = vld [vmem:[#allocation5 + $0x498] sm:$0xf0] }
  0xb4   :  { %1691 = vmatpush.bf16.msra.mxu1 %v2562_v25  ;;  %v3394_v25 = vld [vmem:[#allocation5 + $0x654] sm:$0xf0]  ;;  %v3672_v43 = vpop.f32.mrf.mxu1  ;;  %v3412_v10 = vld [vmem:[#allocation5 + $0x6ec] sm:$0xf]  ;;  %v2806_v15 = vor.u32 %v3348_v2, %v2803_v4  ;;  %v2611_v2 = vld [vmem:[#allocation5 + $0x378] sm:$0xf0] }
  0xb5   :  { %1704 = vmatpush.bf16.msra.mxu2 %v2690_v26  ;;  %v3200_v26 = vld [vmem:[#allocation5 + $0x4c] sm:$0xf]  ;;  %v2978_v33 = vor.u32 %v3394_v25, %v2977_v24  ;;  %v2787_v25 = vld [vmem:[#allocation5 + $0x4d8] sm:$0xf0] }
  0xb6   :  { %1717 = vmatpush.bf16.msra.mxu3 %v2818_v29  ;;  %1679 = vmatmul.bf16.vlgmr.msra.gmra.mxu0 %v3636_v18  ;;  %v3232_v29 = vld [vmem:[#allocation5 + $0x14c] sm:$0xf]  ;;  %v2214_v35 = vor.u32 %v3200_v26, %v2211_v28 }
  0xb7   :  { %1723 = vmatpush.bf16.msrb.mxu0 %v3058_v30  ;;  %1692 = vmatmul.bf16.vlgmr.msra.gmra.mxu1 %v3640_v20  ;;  %v2339_v30 = vld [vmem:[#allocation5 + $0x158] sm:$0xf0]  ;;  %v3376_v26 = vld [vmem:[#allocation5 + $0x5cc] sm:$0xf] }
  0xb8   :  { %1736 = vmatpush.bf16.msrb.mxu1 %v2294_v31  ;;  %1705 = vmatmul.bf16.vlgmr.msra.gmra.mxu2 %v3650_v40  ;;  %v3264_v31 = vld [vmem:[#allocation5 + $0x24c] sm:$0xf] }
  0xb9   :  { %1749 = vmatpush.bf16.msrb.mxu2 %v2422_v32  ;;  %1718 = vmatmul.bf16.vlgmr.msra.gmra.mxu3 %v3652_v41  ;;  %v2467_v32 = vld [vmem:[#allocation5 + $0x258] sm:$0xf0]  ;;  %v3408_v28 = vld [vmem:[#allocation5 + $0x6cc] sm:$0xf] }
  0xba   :  { %1762 = vmatpush.bf16.msrb.mxu3 %v2550_v36  ;;  %v2342_v36 = vor.u32 %v3232_v29, %v2339_v30  ;;  %v2470_v44 = vor.u32 %v3264_v31, %v2467_v32  ;;  %v3043_v29 = vld [vmem:[#allocation5 + $0x6d8] sm:$0xf0]  ;;  %v3300_v1 = vld [vmem:[#allocation5 + $0x36c] sm:$0xf] }
  0xbb   :  { %1724 = vmatpush.bf16.msrb.mxu0 %v3042_v45  ;;  %v2195_v45 = vld [vmem:[#allocation5 + $0x38] sm:$0xf0] }
  0xbc   :  { %1737 = vmatpush.bf16.msrb.mxu1 %v2278_v46  ;;  %v3228_v46 = vld [vmem:[#allocation5 + $0x12c] sm:$0xf]  ;;  %v2198_v53 = vor.u32 %v3196_v42, %v2195_v45  ;;  %v1487_v12 = vpop.f32.mrf.mxu1  ;;  %v3046_v42 = vor.u32 %v3408_v28, %v3043_v29 }
  0xbd   :  { %1750 = vmatpush.bf16.msrb.mxu2 %v2406_v47  ;;  %v2323_v47 = vld [vmem:[#allocation5 + $0x138] sm:$0xf0]  ;;  %v3372_v45 = vld [vmem:[#allocation5 + $0x5ac] sm:$0xf] }
  0xbe   :  { %1763 = vmatpush.bf16.msrb.mxu3 %v2534_v51  ;;  %v2945_v51 = vld [vmem:[#allocation5 + $0x608] sm:$0xf]  ;;  %v2326_v54 = vor.u32 %v3228_v46, %v2323_v47  ;;  %v2899_v46 = vld [vmem:[#allocation5 + $0x5b8] sm:$0xf0]  ;;  %v3404_v47 = vld [vmem:[#allocation5 + $0x6ac] sm:$0xf] }
  0xbf   :  { %1725 = vmatpush.bf16.msrb.mxu0 %v3026_v57  ;;  %v3224_v57 = vld [vmem:[#allocation5 + $0x10c] sm:$0xf]  ;;  %v2946_v3 = vor.u32 %v3386_v52, %v2945_v51  ;;  %v2902_v51 = vor.u32 %v3372_v45, %v2899_v46  ;;  %v2963_v46 = vld [vmem:[#allocation5 + $0x638] sm:$0xf0] }
  0xc0   :  { %1738 = vmatpush.bf16.msrb.mxu1 %v2262_v58  ;;  %v2310_v9 = vor.u32 %v3224_v57, %v2307_v60  ;;  %v3304_v52 = vld [vmem:[#allocation5 + $0x38c] sm:$0xf]  ;;  %v3011_v60 = vld [vmem:[#allocation5 + $0x698] sm:$0xf0] }
  0xc1   :  { %1751 = vmatpush.bf16.msrb.mxu2 %v2390_v59  ;;  %v2454_v59 = vor.u32 %v3260_v48, %v2451_v49  ;;  %v3027_v48 = vld [vmem:[#allocation5 + $0x6b8] sm:$0xf0]  ;;  %v3368_v57 = vld [vmem:[#allocation5 + $0x58c] sm:$0xf] }
  0xc2   :  { %1764 = vmatpush.bf16.msrb.mxu3 %v2518_v63  ;;  %v3030_v55 = vor.u32 %v3404_v47, %v3027_v48  ;;  %v3388_v45 = vld [vmem:[#allocation5 + $0x62c] sm:$0xf]  ;;  %v3690_v47 = vld [vmem:[#allocation7] sm:$0xf] }
  0xc3   :  { %1726 = vmatpush.bf16.msrb.mxu0 %v3010_v5  ;;  %v3380_v5 = vld [vmem:[#allocation5 + $0x5ec] sm:$0xf] }
  0xc4   :  { %1739 = vmatpush.bf16.msrb.mxu1 %v2246_v6  ;;  %v2931_v6 = vld [vmem:[#allocation5 + $0x5f8] sm:$0xf0] }
  0xc5   :  { %1752 = vmatpush.bf16.msrb.mxu2 %v2374_v7  ;;  %v3674_v58 = vpop.f32.mrf.mxu2  ;;  %v1474_v7 = vpop.f32.mrf.mxu0  ;;  %v2934_v16 = vor.u32 %v3380_v5, %v2931_v6  ;;  %v2739_v5 = vld [vmem:[#allocation5 + $0x478] sm:$0xf0]  ;;  %v3364_v6 = vld [vmem:[#allocation5 + $0x56c] sm:$0xf] }
  0xc6   :  { %1765 = vmatpush.bf16.msrb.mxu3 %v2502_v11  ;;  %v3676_v63 = vpop.f32.mrf.mxu3  ;;  %v3059_v11 = vld [vmem:[#allocation5 + $0x6f8] sm:$0xf0] }
  0xc7   :  { %1727 = vmatpush.bf16.msrb.mxu0 %v2994_v17  ;;  %v3312_v17 = vld [vmem:[#allocation5 + $0x3cc] sm:$0xf]  ;;  %v3062_v24 = vor.u32 %v3412_v10, %v3059_v11  ;;  %v2867_v7 = vld [vmem:[#allocation5 + $0x578] sm:$0xf0]  ;;  %v2614_v10 = vor.u32 %v3300_v1, %v2611_v2 }
  0xc8   :  { %1740 = vmatpush.bf16.msrb.mxu1 %v2230_v21  ;;  %v2659_v21 = vld [vmem:[#allocation5 + $0x3d8] sm:$0xf0]  ;;  %v2870_v12 = vor.u32 %v3364_v6, %v2867_v7  ;;  %v3421_v7 = vld [vmem:[#allocation8 + $0x30] sm:$0xff] }
  0xc9   :  { %1753 = vmatpush.bf16.msrb.mxu2 %v2358_v23  ;;  %v3344_v23 = vld [vmem:[#allocation5 + $0x4cc] sm:$0xf]  ;;  %v2662_v31 = vor.u32 %v3312_v17, %v2659_v21  ;;  %v2723_v21 = vld [vmem:[#allocation5 + $0x458] sm:$0xf0] }
  0xca   :  { %1766 = vmatpush.bf16.msrb.mxu3 %v2486_v27  ;;  %v2915_v27 = vld [vmem:[#allocation5 + $0x5d8] sm:$0xf0] }
  0xcb   :  { %1728 = vmatpush.bf16.msrb.mxu0 %v2978_v33  ;;  %v2790_v33 = vor.u32 %v3344_v23, %v2787_v25  ;;  %v3360_v23 = vld [vmem:[#allocation5 + $0x54c] sm:$0xf]  ;;  %v3430_v6 = vld [vmem:[#allocation8 + $0x78] sm:$0xff] }
  0xcc   :  { %1741 = vmatpush.bf16.msrb.mxu1 %v2214_v35  ;;  %v2918_v35 = vor.u32 %v3376_v26, %v2915_v27  ;;  %v3392_v25 = vld [vmem:[#allocation5 + $0x64c] sm:$0xf]  ;;  %v2979_v26 = vld [vmem:[#allocation5 + $0x658] sm:$0xf0] }
  0xcd   :  { %1754 = vmatpush.bf16.msrb.mxu2 %v2342_v36  ;;  %v1500_v30 = vpop.f32.mrf.mxu2  ;;  %v3308_v36 = vld [vmem:[#allocation5 + $0x3ac] sm:$0xf] }
  0xce   :  { %1767 = vmatpush.bf16.msrb.mxu3 %v2470_v44  ;;  %v1513_v32 = vpop.f32.mrf.mxu3  ;;  %v2771_v44 = vld [vmem:[#allocation5 + $0x4b8] sm:$0xf0]  ;;  %v2646_v49 = vor.u32 %v3308_v36, %v2643_v38  ;;  %v3324_v36 = vld [vmem:[#allocation5 + $0x42c] sm:$0xf]  ;;  %v2982_v38 = vor.u32 %v3392_v25, %v2979_v26 }
  0xcf   :  { %1729 = vmatpush.bf16.msrb.mxu0 %v2962_v50  ;;  %v2774_v50 = vor.u32 %v3340_v39, %v2771_v44  ;;  %v2707_v39 = vld [vmem:[#allocation5 + $0x438] sm:$0xf0] }
  0xd0   :  { %1742 = vmatpush.bf16.msrb.mxu1 %v2198_v53  ;;  %v2627_v53 = vld [vmem:[#allocation5 + $0x398] sm:$0xf0] }
  0xd1   :  { %1755 = vmatpush.bf16.msrb.mxu2 %v2326_v54  ;;  %v3336_v54 = vld [vmem:[#allocation5 + $0x48c] sm:$0xf]  ;;  %v2835_v44 = vld [vmem:[#allocation5 + $0x538] sm:$0xf0] }
  0xd2   :  { %1768 = vmatpush.bf16.msrb.mxu3 %v2454_v59  ;;  %v3400_v59 = vld [vmem:[#allocation5 + $0x68c] sm:$0xf] }
  0xd3   :  { %1730 = vmatpush.bf16.msrb.mxu0 %v2946_v3  ;;  %v3682_v61 = vpop.f32.mrf.mxu0  ;;  %v3332_v3 = vld [vmem:[#allocation5 + $0x46c] sm:$0xf]  ;;  %v3014_v4 = vor.u32 %v3400_v59, %v3011_v60  ;;  %v310_v59 = vperm.slane %v3690_v47, 0 }
  0xd4   :  { %1743 = vmatpush.bf16.msrb.mxu1 %v2182_v8  ;;  %v3684_v62 = vpop.f32.mrf.mxu1  ;;  %v3396_v8 = vld [vmem:[#allocation5 + $0x66c] sm:$0xf]  ;;  %v2742_v11 = vor.u32 %v3332_v3, %v2739_v5 }
  0xd5   :  { %1756 = vmatpush.bf16.msrb.mxu2 %v2310_v9  ;;  %v2995_v9 = vld [vmem:[#allocation5 + $0x678] sm:$0xf0]  ;;  %v3384_v60 = vld [vmem:[#allocation5 + $0x60c] sm:$0xf]  ;;  %v1473_v5 = vadd.f32 %v3670_v34, %v310_v59  ;;  %v3433_v59 = vld [vmem:[#allocation8 + $0x90] sm:$0xff] }
  0xd6   :  { %1769 = vmatpush.bf16.msrb.mxu3 %v2438_v13  ;;  %1731 = vmatmul.bf16.vlgmr.msrb.gmra.mxu0 %v3648_v37  ;;  %v3296_v13 = vld [vmem:[#allocation5 + $0x34c] sm:$0xf]  ;;  %v2998_v17 = vor.u32 %v3396_v8, %v2995_v9  ;;  %v3429_v9 = vld [vmem:[#allocation8 + $0x70] sm:$0xff] }
  0xd7   :  { %1775 = vmatpush.bf16.msra.mxu0 %v2678_v14  ;;  %1744 = vmatmul.bf16.vlgmr.msrb.gmra.mxu1 %v3638_v19  ;;  %v2758_v19 = vor.u32 %v3336_v54, %v2755_v56  ;;  %v2595_v14 = vld [vmem:[#allocation5 + $0x358] sm:$0xf0]  ;;  %v1486_v8 = vadd.f32 %v3672_v43, %v1473_v5  ;;  %v3420_v34 = vld [vmem:[#allocation8 + $0x28] sm:$0xff] }
  0xd8   :  { %1788 = vmatpush.bf16.msra.mxu1 %v2806_v15  ;;  %1757 = vmatmul.bf16.vlgmr.msrb.gmra.mxu2 %v3642_v22  ;;  %v2883_v22 = vld [vmem:[#allocation5 + $0x598] sm:$0xf0]  ;;  %v3328_v15 = vld [vmem:[#allocation5 + $0x44c] sm:$0xf]  ;;  %v2598_v28 = vor.u32 %v3296_v13, %v2595_v14  ;;  %v3427_v14 = vld [vmem:[#allocation8 + $0x60] sm:$0xff] }
  0xd9   :  { %1801 = vmatpush.bf16.msra.mxu2 %v2934_v16  ;;  %1770 = vmatmul.bf16.vlgmr.msrb.gmra.mxu3 %v3636_v18  ;;  %v2630_v18 = vor.u32 %v3304_v52, %v2627_v53  ;;  %v2886_v0 = vor.u32 %v3368_v57, %v2883_v22  ;;  %v2563_v52 = vld [vmem:[#allocation5 + $0x318] sm:$0xf0]  ;;  %v3320_v53 = vld [vmem:[#allocation5 + $0x40c] sm:$0xf] }
  0xda   :  { %1814 = vmatpush.bf16.msra.mxu3 %v3062_v24  ;;  %v2851_v24 = vld [vmem:[#allocation5 + $0x558] sm:$0xf0]  ;;  %v3352_v57 = vld [vmem:[#allocation5 + $0x50c] sm:$0xf] }
  0xdb   :  { %1776 = vmatpush.bf16.msra.mxu0 %v2662_v31  ;;  %v3686_v16 = vpop.f32.mrf.mxu2  ;;  %v1526_v29 = vpop.f32.mrf.mxu0  ;;  %v2726_v31 = vor.u32 %v3328_v15, %v2723_v21  ;;  %v2854_v32 = vor.u32 %v3360_v23, %v2851_v24  ;;  %v2691_v56 = vld [vmem:[#allocation5 + $0x418] sm:$0xf0]  ;;  %v3417_v21 = vld [vmem:[#allocation8 + $0x10] sm:$0xff] }
  0xdc   :  { %1789 = vmatpush.bf16.msra.mxu1 %v2790_v33  ;;  %v3688_v27 = vpop.f32.mrf.mxu3  ;;  %v1539_v30 = vpop.f32.mrf.mxu1  ;;  %v3292_v33 = vld [vmem:[#allocation5 + $0x32c] sm:$0xf]  ;;  %v2819_v22 = vld [vmem:[#allocation5 + $0x518] sm:$0xf0]  ;;  %v2694_v1 = vor.u32 %v3320_v53, %v2691_v56  ;;  %v3435_v53 = vld [vmem:[#allocation8 + $0xa0] sm:$0xff] }
  0xdd   :  { %1802 = vmatpush.bf16.msra.mxu2 %v2918_v35  ;;  %v2579_v35 = vld [vmem:[#allocation5 + $0x338] sm:$0xf0]  ;;  %v2822_v2 = vor.u32 %v3352_v57, %v2819_v22  ;;  %v3424_v30 = vld [vmem:[#allocation8 + $0x48] sm:$0xff] }
  0xde   :  { %1815 = vmatpush.bf16.msra.mxu3 %v3046_v42  ;;  %v3356_v42 = vld [vmem:[#allocation5 + $0x52c] sm:$0xf]  ;;  %v2582_v48 = vor.u32 %v3292_v33, %v2579_v35  ;;  %v3438_v29 = vld [vmem:[#allocation8 + $0xb8] sm:$0xff]  ;;  %v3415_v35 = vld [vmem:[#allocation8] sm:$0xff] }
  0xdf   :  { %1777 = vmatpush.bf16.msra.mxu0 %v2646_v49  ;;  %v2710_v49 = vor.u32 %v3324_v36, %v2707_v39  ;;  %v3434_v57 = vld [vmem:[#allocation8 + $0x98] sm:$0xff] }
  0xe0   :  { %1790 = vmatpush.bf16.msra.mxu1 %v2774_v50  ;;  %v2838_v50 = vor.u32 %v3356_v42, %v2835_v44  ;;  %v3446_v5 = vld [vmem:[#allocation8 + $0xf8] sm:$0xff] }
  0xe1   :  { %1803 = vmatpush.bf16.msra.mxu2 %v2902_v51  ;;  %v3288_v51 = vld [vmem:[#allocation5 + $0x30c] sm:$0xf] }
  0xe2   :  { %1816 = vmatpush.bf16.msra.mxu3 %v3030_v55  ;;  %v2966_v55 = vor.u32 %v3388_v45, %v2963_v46 }
  0xe3   :  { %1778 = vmatpush.bf16.msra.mxu0 %v2630_v18  ;;  %v1552_v54 = vpop.f32.mrf.mxu2  ;;  %v2947_v18 = vld [vmem:[#allocation5 + $0x618] sm:$0xf0] }
  0xe4   :  { %1791 = vmatpush.bf16.msra.mxu1 %v2758_v19  ;;  %v1565_v19 = vpop.f32.mrf.mxu3  ;;  %v2950_v3 = vor.u32 %v3384_v60, %v2947_v18  ;;  %v3432_v18 = vld [vmem:[#allocation8 + $0x88] sm:$0xff] }
  0xe5   :  { %1804 = vmatpush.bf16.msra.mxu2 %v2886_v0  ;;  %v2566_v0 = vor.u32 %v3288_v51, %v2563_v52 }
  0xe6   :  { %1817 = vmatpush.bf16.msra.mxu3 %v3014_v4  ;;  %v3422_v4 = vld [vmem:[#allocation8 + $0x38] sm:$0xff] }
  0xe7   :  { %1779 = vmatpush.bf16.msra.mxu0 %v2614_v10  ;;  %v1499_v10 = vadd.f32 %v3674_v58, %v1486_v8  ;;  %v311_v58 = vperm.slane %v3690_v47, 1 }
  0xe8   :  { %1792 = vmatpush.bf16.msra.mxu1 %v2742_v11  ;;  %v3428_v11 = vld [vmem:[#allocation8 + $0x68] sm:$0xff] }
  0xe9   :  { %1805 = vmatpush.bf16.msra.mxu2 %v2870_v12  ;;  %v3419_v12 = vld [vmem:[#allocation8 + $0x20] sm:$0xff]  ;;  %v1512_v43 = vadd.f32 %v3676_v63, %v1499_v10  ;;  %v3425_v63 = vld [vmem:[#allocation8 + $0x50] sm:$0xff]  ;;  %v1564_v26 = vadd.f32 %v3688_v27, %v311_v58 }
  0xea   :  { %1818 = vmatpush.bf16.msra.mxu3 %v2998_v17 }
  0xeb   :  { %1780 = vmatpush.bf16.msra.mxu0 %v2598_v28  ;;  %v3416_v28 = vld [vmem:[#allocation8 + $0x8] sm:$0xff] }
  0xec   :  { %1793 = vmatpush.bf16.msra.mxu1 %v2726_v31 }
  0xed   :  { %1806 = vmatpush.bf16.msra.mxu2 %v2854_v32 }
  0xee   :  { %1819 = vmatpush.bf16.msra.mxu3 %v2982_v38 }
  0xef   :  { %1781 = vmatpush.bf16.msra.mxu0 %v2582_v48 }
  0xf0   :  { %1794 = vmatpush.bf16.msra.mxu1 %v2710_v49 }
  0xf1   :  { %1807 = vmatpush.bf16.msra.mxu2 %v2838_v50  ;;  %v3436_v50 = vld [vmem:[#allocation8 + $0xa8] sm:$0xff] }
  0xf2   :  { %1820 = vmatpush.bf16.msra.mxu3 %v2966_v55 }
  0xf3   :  { %1782 = vmatpush.bf16.msra.mxu0 %v2566_v0  ;;  %v1576_v13 = vpop.f32.mrf.mxu0 }
  0xf4   :  { %1795 = vmatpush.bf16.msra.mxu1 %v2694_v1  ;;  %v1577_v33 = vadd.f32 %v1576_v13, %v1564_v26  ;;  %v3431_v1 = vld [vmem:[#allocation8 + $0x80] sm:$0xff] }
  0xf5   :  { %1808 = vmatpush.bf16.msra.mxu2 %v2822_v2  ;;  %v312_v2 = vperm.slane %v3690_v47, 2 }
  0xf6   :  { %1821 = vmatpush.bf16.msra.mxu3 %v2950_v3  ;;  %1783 = vmatmul.bf16.vlgmr.msra.gmra.mxu0 %v3640_v20  ;;  %v1589_v20 = vpop.f32.mrf.mxu1 }
  0xf7   :  { %2095 = vmatpush.bf16.msrb.mxu0 %v3422_v4  ;;  %1796 = vmatmul.bf16.vlgmr.msra.gmra.mxu1 %v3650_v40  ;;  %v3418_v40 = vld [vmem:[#allocation8 + $0x18] sm:$0xff]  ;;  %v1590_v38 = vadd.f32 %v1589_v20, %v1577_v33 }
  0xf8   :  { %2108 = vmatpush.bf16.msrb.mxu1 %v3430_v6  ;;  %1809 = vmatmul.bf16.vlgmr.msra.gmra.mxu2 %v3652_v41  ;;  %v1525_v41 = vadd.f32 %v3682_v61, %v1512_v43  ;;  %v3443_v43 = vld [vmem:[#allocation8 + $0xe0] sm:$0xff] }
  0xf9   :  { %1822 = vmatmul.bf16.vlgmr.msra.gmra.mxu3 %v3648_v37  ;;  %v3426_v37 = vld [vmem:[#allocation8 + $0x58] sm:$0xff]  ;;  %2121 = vmatpush.bf16.msrb.mxu2 %v3438_v29 }
  0xfa   :  { %v1538_v24 = vadd.f32 %v3684_v62, %v1525_v41  ;;  %v3423_v62 = vld [vmem:[#allocation8 + $0x40] sm:$0xff]  ;;  %2134 = vmatpush.bf16.msrb.mxu3 %v3446_v5 }
  0xfb   :  { %2096 = vmatpush.bf16.msrb.mxu0 %v3421_v7  ;;  %v1602_v15 = vpop.f32.mrf.mxu2  ;;  %v1578_v23 = vpop.f32.mrf.mxu0 }
  0xfc   :  { %2109 = vmatpush.bf16.msrb.mxu1 %v3429_v9  ;;  %v1615_v17 = vpop.f32.mrf.mxu3  ;;  %v1551_v61 = vadd.f32 %v3686_v16, %v1538_v24  ;;  %v1603_v27 = vadd.f32 %v1602_v15, %v1590_v38  ;;  %v3437_v16 = vld [vmem:[#allocation8 + $0xb0] sm:$0xff]  ;;  %v3440_v24 = vld [vmem:[#allocation8 + $0xc8] sm:$0xff] }
  0xfd   :  { %2122 = vmatpush.bf16.msrb.mxu2 %v3437_v16  ;;  %v3445_v9 = vld [vmem:[#allocation8 + $0xf0] sm:$0xff] }
  0xfe   :  { %v1591_v25 = vpop.f32.mrf.mxu1  ;;  %v1827_v36 = vmax.f32 %v1551_v61, 0.0  ;;  %v1616_v42 = vadd.f32 %v1615_v17, %v1603_v27  ;;  %2135 = vmatpush.bf16.msrb.mxu3 %v3445_v9 }
  0xff   :  { %2097 = vmatpush.bf16.msrb.mxu0 %v3420_v34 }
 0x100   :  { %2110 = vmatpush.bf16.msrb.mxu1 %v3428_v11  ;;  %v1831_v39 = vpack.c.bf16 %v1827_v36, %v1827_v36  ;;  %v3444_v11 = vld [vmem:[#allocation8 + $0xe8] sm:$0xff] }
 0x101   :  { %2123 = vmatpush.bf16.msrb.mxu2 %v3436_v50 }
 0x102   :  { %2136 = vmatpush.bf16.msrb.mxu3 %v3444_v11 }
 0x103   :  { %2098 = vmatpush.bf16.msrb.mxu0 %v3419_v12  ;;  %v1604_v31 = vpop.f32.mrf.mxu2 }
 0x104   :  { %2111 = vmatpush.bf16.msrb.mxu1 %v3427_v14  ;;  %v1617_v32 = vpop.f32.mrf.mxu3  ;;  %v313_v31 = vperm.slane %v3690_v47, 3 }
 0x105   :  { %2124 = vmatpush.bf16.msrb.mxu2 %v3435_v53  ;;  %v3456_v53 = vld [vmem:[%s3718_s4] ss:$0 sm:$0xff] }
 0x106   :  { %2137 = vmatpush.bf16.msrb.mxu3 %v3443_v43 }
 0x107   :  { %2099 = vmatpush.bf16.msrb.mxu0 %v3418_v40  ;;  %v3442_v40 = vld [vmem:[#allocation8 + $0xd8] sm:$0xff] }
 0x108   :  { %2112 = vmatpush.bf16.msrb.mxu1 %v3426_v37  ;;  %v3441_v37 = vld [vmem:[#allocation8 + $0xd0] sm:$0xff] }
 0x109   :  { %2125 = vmatpush.bf16.msrb.mxu2 %v3434_v57 }
 0x10a   :  { %2138 = vmatpush.bf16.msrb.mxu3 %v3442_v40 }
 0x10b   :  { %2100 = vmatpush.bf16.msrb.mxu0 %v3417_v21 }
 0x10c   :  { %2113 = vmatpush.bf16.msrb.mxu1 %v3425_v63 }
 0x10d   :  { %2126 = vmatpush.bf16.msrb.mxu2 %v3433_v59 }
 0x10e   :  { %2139 = vmatpush.bf16.msrb.mxu3 %v3441_v37 }
 0x10f   :  { %2101 = vmatpush.bf16.msrb.mxu0 %v3416_v28  ;;  %v3439_v28 = vld [vmem:[#allocation8 + $0xc0] sm:$0xff] }
 0x110   :  { %2114 = vmatpush.bf16.msrb.mxu1 %v3424_v30 }
 0x111   :  { %2127 = vmatpush.bf16.msrb.mxu2 %v3432_v18 }
 0x112   :  { %2140 = vmatpush.bf16.msrb.mxu3 %v3440_v24 }
 0x113   :  { %2102 = vmatpush.bf16.msrb.mxu0 %v3415_v35  ;;  %v1628_v44 = vpop.f32.mrf.mxu0 }
 0x114   :  { %2115 = vmatpush.bf16.msrb.mxu1 %v3423_v62  ;;  %v1629_v45 = vadd.f32 %v1628_v44, %v1616_v42  ;;  %v1641_v46 = vpop.f32.mrf.mxu1 }
 0x115   :  { %2128 = vmatpush.bf16.msrb.mxu2 %v3431_v1 }
 0x116   :  { %2103 = vmatmul.bf16.vlgmr.msrb.gmra.mxu0 %v1831_v39  ;;  %v1642_v48 = vadd.f32 %v1641_v46, %v1629_v45  ;;  %2141 = vmatpush.bf16.msrb.mxu3 %v3439_v28 }
 0x118   :  { %v1828_v49 = vmax.f32 %v1642_v48, 0.0 }
 0x11a   :  { %v1832_v51 = vpack.c.bf16 %v1828_v49, %v1828_v49 }
 0x11b   :  { %v1654_v52 = vpop.f32.mrf.mxu2  ;;  %v1630_v55 = vpop.f32.mrf.mxu0 }
 0x11c   :  { %v1667_v54 = vpop.f32.mrf.mxu3  ;;  %2116 = vmatmul.bf16.vlgmr.msrb.gmra.mxu1 %v1832_v51  ;;  %v1643_v56 = vpop.f32.mrf.mxu1  ;;  %v1655_v6 = vadd.f32 %v1654_v52, %v312_v2 }
 0x11e   :  { %v1668_v34 = vadd.f32 %v1667_v54, %v1655_v6 }
 0x123   :  { %v1656_v22 = vpop.f32.mrf.mxu2 }
 0x124   :  { %v1669_v60 = vpop.f32.mrf.mxu3 }
 0x133   :  { %v1680_v19 = vpop.f32.mrf.mxu0 }
 0x134   :  { %v1693_v0 = vpop.f32.mrf.mxu1  ;;  %v1681_v13 = vadd.f32 %v1680_v19, %v1668_v34 }
 0x136   :  { %v1694_v20 = vadd.f32 %v1693_v0, %v1681_v13 }
 0x13b   :  { %v1706_v3 = vpop.f32.mrf.mxu2  ;;  %v1682_v7 = vpop.f32.mrf.mxu0 }
 0x13c   :  { %v1719_v4 = vpop.f32.mrf.mxu3  ;;  %v1695_v8 = vpop.f32.mrf.mxu1  ;;  %v1707_v14 = vadd.f32 %v1706_v3, %v1694_v20 }
 0x13e   :  { %v1720_v41 = vadd.f32 %v1719_v4, %v1707_v14 }
 0x143   :  { %v1708_v10 = vpop.f32.mrf.mxu2 }
 0x144   :  { %v1721_v12 = vpop.f32.mrf.mxu3 }
 0x153   :  { %v1732_v15 = vpop.f32.mrf.mxu0 }
 0x154   :  { %v1733_v17 = vadd.f32 %v1732_v15, %v1720_v41  ;;  %v1745_v58 = vpop.f32.mrf.mxu1 }
 0x155   :  { %v1746_v32 = vadd.f32 %v1745_v58, %v313_v31 }
 0x156   :  { %v1829_v21 = vmax.f32 %v1733_v17, 0.0 }
 0x158   :  { %v1833_v23 = vpack.c.bf16 %v1829_v21, %v1829_v21 }
 0x15a   :  { %2129 = vmatmul.bf16.vlgmr.msrb.gmra.mxu2 %v1833_v23 }
 0x15b   :  { %v1758_v25 = vpop.f32.mrf.mxu2  ;;  %v1734_v26 = vpop.f32.mrf.mxu0 }
 0x15c   :  { %v1771_v63 = vpop.f32.mrf.mxu3  ;;  %v1747_v29 = vpop.f32.mrf.mxu1  ;;  %v1759_v33 = vadd.f32 %v1758_v25, %v1746_v32 }
 0x15e   :  { %v1772_v35 = vadd.f32 %v1771_v63, %v1759_v33 }
 0x163   :  { %v1760_v61 = vpop.f32.mrf.mxu2 }
 0x164   :  { %v1773_v30 = vpop.f32.mrf.mxu3 }
 0x173   :  { %v1784_v36 = vpop.f32.mrf.mxu0 }
 0x174   :  { %v1797_v62 = vpop.f32.mrf.mxu1  ;;  %v1785_v38 = vadd.f32 %v1784_v36, %v1772_v35 }
 0x176   :  { %v1798_v39 = vadd.f32 %v1797_v62, %v1785_v38 }
 0x17b   :  { %v1810_v27 = vpop.f32.mrf.mxu2  ;;  %v1786_v16 = vpop.f32.mrf.mxu0 }
 0x17c   :  { %v1811_v42 = vadd.f32 %v1810_v27, %v1798_v39  ;;  %v1823_v44 = vpop.f32.mrf.mxu3  ;;  %v1799_v45 = vpop.f32.mrf.mxu1 }
 0x17e   :  { %v1824_v46 = vadd.f32 %v1823_v44, %v1811_v42 }
 0x180   :  { %v1830_v48 = vmax.f32 %v1824_v46, 0.0 }
 0x182   :  { %v1834_v49 = vpack.c.bf16 %v1830_v48, %v1830_v48 }
 0x183   :  { %v1812_v50 = vpop.f32.mrf.mxu2 }
 0x184   :  { %v1825_v51 = vpop.f32.mrf.mxu3  ;;  %2142 = vmatmul.bf16.vlgmr.msrb.gmra.mxu3 %v1834_v49 }
 0x193   :  { %v2104_v52 = vpop.f32.mrf.mxu0 }
 0x194   :  { %v2105_v54 = vadd.f32 %v3456_v53, %v2104_v52 }
 0x199   :  { %v2117_v55 = vpop.f32.mrf.mxu1 }
 0x19a   :  { %v2118_v56 = vadd.f32 %v2117_v55, %v2105_v54 }
 0x19b   :  { %v2106_v47 = vpop.f32.mrf.mxu0 }
 0x1a1   :  { %v2119_v57 = vpop.f32.mrf.mxu1 }
 0x1dd   :  { %v2130_v22 = vpop.f32.mrf.mxu2 }
 0x1de   :  { %v2131_v60 = vadd.f32 %v2130_v22, %v2118_v56 }
 0x1e5   :  { %v2132_v59 = vpop.f32.mrf.mxu2 }
 0x207   :  { %v2143_v18 = vpop.f32.mrf.mxu3 }
 0x208   :  { %v2144_v19 = vadd.f32 %v2143_v18, %v2131_v60 }
 0x20a   :  { %2147 = vst [vmem:[#allocation10] sm:$0xff] %v2144_v19 }
 0x20b   :  { %2158 = dma.vmem_to_hbm [thread:$0]  %s2154_s16, 128, %s2156_s19, [#allocation4]  }
 0x20f   :  { %v2145_v0 = vpop.f32.mrf.mxu3 }
 0x210   :  { %3583 = dma.done.wait [#allocation4], 128  }
 0x211   :  { %3584 = vsyncadd [#allocation4], 4294967168 }
 0x212   :  { %2163 = vsyncpa [#allocation3], 1 }
 0x213   :  { %2164 = vsyncpa [#allocation6], 1 }
 0x214   :  { %2165 = vsyncpa [#allocation9], 1 }
 0x215   :  { %2166 = vsyncpa [#allocation4], 1 }

</bundles_post_ra>
